<compile_context>
chip_gen: v7x
topology: tpu7x:2x2x1
jax: 0.10.0
libtpu: 0.0.40
codegen_flags: <defaults>
</compile_context>

<pallas_src>
import functools

import jax
import jax.numpy as jnp
import numpy as np
from jax import lax
from jax.experimental import pallas as pl
from jax.experimental.pallas import tpu as pltpu


# ---------------------------------------------------------------------------
# Fully fused kernel: conv -> BN batch stats -> affine -> ReLU -> compact store
# ---------------------------------------------------------------------------
def _make_fused_kernel(*, N, C_in, C_out, offs, L, L_pad, Wp, W_out, H_out, eps):
    inv_count = 1.0 / float(N * H_out * W_out)

    def kernel(x_ref, w_ref, gb_ref, m_ref, o_ref, xstk_ref):
        # ---- 1) build the stacked tap matrix in VMEM ---------------------
        # Zero first so the per-sample lane-pad tail (columns [L, L_pad)) can
        # never inject garbage/NaNs into the masked statistics.
        xstk_ref[...] = jnp.zeros_like(xstk_ref)
        for n in range(N):                         # static unroll (tiny N)
            for t, off in enumerate(offs):         # static unroll, K*K taps
                xstk_ref[t * C_in:(t + 1) * C_in,
                         n * L_pad:n * L_pad + L] = x_ref[n, :, off:off + L]

        # ---- 2) one MXU dot: conv for the whole batch --------------------
        acc = jnp.dot(w_ref[...], xstk_ref[...],
                      preferred_element_type=jnp.float32)    # (C_out, N*L_pad)

        # ---- 3) BatchNorm batch statistics (exact two-pass) --------------
        m = m_ref[...]                                        # (1, N*L_pad) 0/1
        mean = jnp.sum(acc * m, axis=1, keepdims=True) * inv_count   # (C_out, 1)
        ctr = (acc - mean) * m                                # centered, junk/pad zeroed
        var = jnp.sum(ctr * ctr, axis=1, keepdims=True) * inv_count  # (C_out, 1)
        scale = gb_ref[:, 0:1] * lax.rsqrt(var + eps)         # gamma * inv_std (EUP)
        bias = gb_ref[:, 1:2]

        y = jnp.maximum(ctr * scale + bias, 0.0)              # (C_out, N*L_pad)

        # ---- 4) compact (drop w >= W_out wrap columns) channel-major store
        for n in range(N):                         # static unroll
            for h in range(H_out):
                src = n * L_pad + h * Wp
                o_ref[n, :, h * W_out:(h + 1) * W_out] = y[:, src:src + W_out]

    return kernel


# ---------------------------------------------------------------------------
# Wrapper
# ---------------------------------------------------------------------------
@functools.partial(jax.jit, static_argnames=("kernel_size", "dilation", "eps"))
def block_conv_forward(x, conv_w, gamma, beta, *, kernel_size, dilation=1, eps=1e-5):
    """Forward of BlockConv: conv(no bias) -> BatchNorm2d(train mode) -> ReLU.

    x:      (N, C_in, H, W)  float32 (NCHW)
    conv_w: (C_out, C_in, K, K)
    gamma, beta: (C_out,)
    returns (N, C_out, H_out, W_out)
    """
    N, C_in, H, W = x.shape
    C_out = conv_w.shape[0]
    K = kernel_size
    d = dilation
    pad = d * (K // 2)                       # same formula as the PyTorch module
    Hp, Wp = H + 2 * pad, W + 2 * pad
    H_out = Hp - d * (K - 1)
    W_out = Wp - d * (K - 1)
    extra = d * (K - 1)                      # tail room so every tap slice is in-bounds
    extra_rows = -(-extra // Wp)             # ceil(extra / Wp)
    Lp = (Hp + extra_rows) * Wp              # flattened padded sample length
    L = H_out * Wp                           # per-sample "wide" (junk-carrying) length
    L_pad = -(-L // 128) * 128               # lane-aligned per-sample stride in scratch
    HW = H_out * W_out
    KKC = K * K * C_in

    # Static tap offsets into the flattened padded image (kh-major, kw-minor).
    offs = tuple(kh * d * Wp + kw * d for kh in range(K) for kw in range(K))
    # Invariants the kernel's static slicing relies on (review correctness note).
    assert max(offs) + L <= Lp, (max(offs), L, Lp)
    assert L_pad >= L and W_out <= Wp

    x = x.astype(jnp.float32)
    # Single pad pass over x: the extra bottom rows provide the tap tail.
    xflat = jnp.pad(
        x, ((0, 0), (0, 0), (pad, pad + extra_rows), (pad, pad))
    ).reshape(N, C_in, Lp)

    # Lane-dense stacked weights: column order = (tap, c_in), matching the scratch.
    w_stk = jnp.transpose(conv_w.astype(jnp.float32), (0, 2, 3, 1)).reshape(C_out, KKC)
    gb = jnp.stack([gamma.astype(jnp.float32), beta.astype(jnp.float32)], axis=1)

    # Column-validity mask over the (N, L_pad) wide layout, baked at trace time.
    j = np.arange(L_pad)
    m1 = ((j < L) & ((j % Wp) < W_out)).astype(np.float32)
    col_mask = jnp.asarray(np.tile(m1, N).reshape(1, N * L_pad))

    # Generation-aware VMEM budget + guard for the fully-resident scheme.
    vmem_cap = 64 * 1024 * 1024              # conservative default (v7x)
    try:
        vmem_cap = int(pltpu.get_tpu_info().vmem_capacity_bytes)
    except Exception:
        pass
    x_bytes = N * C_in * Lp * 4
    out_bytes = N * C_out * HW * 4
    small_bytes = (C_out * KKC + C_out * 2 + N * L_pad) * 4
    stk_bytes = KKC * N * L_pad * 4
    vmem_need = 2 * (x_bytes + out_bytes + small_bytes) + stk_bytes
    if vmem_need > int(0.6 * vmem_cap):
        # TODO(synk): implement halo'd H_out tiling + per-core grid for big images.
        raise NotImplementedError("BlockConv Pallas kernel: working set exceeds VMEM")
    vmem_limit = int(min(0.7 * vmem_cap, max(8 * 1024 * 1024, 4 * vmem_need)))

    cost = pl.CostEstimate(
        flops=2 * N * C_out * KKC * L + 8 * N * C_out * L,
        transcendentals=C_out,
        bytes_accessed=x_bytes + out_bytes + small_bytes,
    )

    kernel = _make_fused_kernel(
        N=N, C_in=C_in, C_out=C_out, offs=offs, L=L, L_pad=L_pad,
        Wp=Wp, W_out=W_out, H_out=H_out, eps=float(eps))

    y = pl.pallas_call(
        kernel,
        out_shape=jax.ShapeDtypeStruct((N, C_out, HW), jnp.float32),
        grid_spec=pltpu.PrefetchScalarGridSpec(
            num_scalar_prefetch=0,
            grid=(1,),
            in_specs=[
                pl.BlockSpec((N, C_in, Lp), lambda i: (0, 0, 0)),
                pl.BlockSpec((C_out, KKC), lambda i: (0, 0)),
                pl.BlockSpec((C_out, 2), lambda i: (0, 0)),
                pl.BlockSpec((1, N * L_pad), lambda i: (0, 0)),
            ],
            out_specs=pl.BlockSpec((N, C_out, HW), lambda i: (0, 0, 0)),
            scratch_shapes=[pltpu.VMEM((KKC, N * L_pad), jnp.float32)],
        ),
        compiler_params=pltpu.CompilerParams(
            dimension_semantics=("arbitrary",),
            vmem_limit_bytes=vmem_limit,
        ),
        cost_estimate=cost,
    )(xflat, w_stk, gb, col_mask)

    # Kernel already wrote compact channel-major rows; this is a free
    # last-dim split (contiguous reshape), not a data pass.
    return y.reshape(N, C_out, H_out, W_out)


# ---------------------------------------------------------------------------
# Reference (pure JAX) for a sanity check
# ---------------------------------------------------------------------------
def _reference(x, conv_w, gamma, beta, kernel_size, dilation, eps=1e-5):
    pad = dilation * (kernel_size // 2)
    y = lax.conv_general_dilated(
        x, conv_w,
        window_strides=(1, 1),
        padding=[(pad, pad), (pad, pad)],
        rhs_dilation=(dilation, dilation),
        dimension_numbers=("NCHW", "OIHW", "NCHW"),
    )
    mean = jnp.mean(y, axis=(0, 2, 3), keepdims=True)
    var = jnp.mean((y - mean) ** 2, axis=(0, 2, 3), keepdims=True)
    yhat = (y - mean) * lax.rsqrt(var + eps)
    yhat = yhat * gamma.reshape(1, -1, 1, 1) + beta.reshape(1, -1, 1, 1)
    return jnp.maximum(yhat, 0.0)


if __name__ == "__main__":
    # Module config: BlockConv(in_planes=4, out_planes=8, kernel_size=3, dilation=1)
    N, C_in, H, W = 2, 4, 16, 16
    C_out, K, dilation = 8, 3, 1

    key = jax.random.PRNGKey(0)
    kx, kw, kg, kb = jax.random.split(key, 4)
    x = jax.random.normal(kx, (N, C_in, H, W), dtype=jnp.float32)
    conv_w = jax.random.normal(kw, (C_out, C_in, K, K), dtype=jnp.float32) * 0.1
    gamma = 1.0 + 0.1 * jax.random.normal(kg, (C_out,), dtype=jnp.float32)
    beta = 0.1 * jax.random.normal(kb, (C_out,), dtype=jnp.float32)

    out = block_conv_forward(x, conv_w, gamma, beta, kernel_size=K, dilation=dilation)
    out = jax.block_until_ready(out)

    ref = _reference(x, conv_w, gamma, beta, K, dilation)
    np.testing.assert_allclose(np.asarray(out), np.asarray(ref), atol=2e-4, rtol=2e-4)

    print("KERNEL_OK")
</pallas_src>

<mosaic_0001>
module attributes {stable_mosaic.version = 11 : i64} {
  func.func @kernel(%arg0: i32, %arg1: memref<2x4x342xf32, #tpu.memory_space<vmem>>, %arg2: memref<8x36xf32, #tpu.memory_space<vmem>>, %arg3: memref<8x2xf32, #tpu.memory_space<vmem>>, %arg4: memref<1x768xf32, #tpu.memory_space<vmem>>, %arg5: memref<2x8x256xf32, #tpu.memory_space<vmem>>, %arg6: memref<36x768xf32, #tpu.memory_space<vmem>>) attributes {dimension_semantics = [#tpu.dimension_semantics<arbitrary>], iteration_bounds = array<i64: 1>, scalar_prefetch = 0 : i64, scratch_operands = 1 : i64, tpu.core_type = #tpu.core_type<tc>, window_params = [{pipeline_mode = #tpu.pipeline_mode<synchronous>, transform_indices = @transform_0, window_bounds = array<i64: 2, 4, 342>}, {pipeline_mode = #tpu.pipeline_mode<synchronous>, transform_indices = @transform_1, window_bounds = array<i64: 8, 36>}, {pipeline_mode = #tpu.pipeline_mode<synchronous>, transform_indices = @transform_2, window_bounds = array<i64: 8, 2>}, {pipeline_mode = #tpu.pipeline_mode<synchronous>, transform_indices = @transform_3, window_bounds = array<i64: 1, 768>}, {pipeline_mode = #tpu.pipeline_mode<synchronous>, transform_indices = @transform_4, window_bounds = array<i64: 2, 8, 256>}]} {
    %cst = arith.constant 0.000000e+00 : f32
    %0 = vector.broadcast %cst : f32 to vector<36x768xf32>
    %c0 = arith.constant 0 : index
    %c0_0 = arith.constant 0 : index
    %1 = vector.load %arg6[%c0, %c0_0] : memref<36x768xf32, #tpu.memory_space<vmem>>, vector<36x768xf32>
    tpu.vector_store %arg6[%c0, %c0_0], %0 {strides = array<i32>} : memref<36x768xf32, #tpu.memory_space<vmem>>, vector<36x768xf32>,
    %c0_1 = arith.constant 0 : index
    %c0_2 = arith.constant 0 : index
    %c0_3 = arith.constant 0 : index
    %2 = vector.load %arg1[%c0_1, %c0_2, %c0_3] : memref<2x4x342xf32, #tpu.memory_space<vmem>>, vector<1x4x288xf32>
    %3 = vector.shape_cast %2 : vector<1x4x288xf32> to vector<4x288xf32>
    %c0_4 = arith.constant 0 : index
    %c0_5 = arith.constant 0 : index
    %4 = vector.load %arg6[%c0_4, %c0_5] : memref<36x768xf32, #tpu.memory_space<vmem>>, vector<4x288xf32>
    tpu.vector_store %arg6[%c0_4, %c0_5], %3 {strides = array<i32>} : memref<36x768xf32, #tpu.memory_space<vmem>>, vector<4x288xf32>,
    %c0_6 = arith.constant 0 : index
    %c0_7 = arith.constant 0 : index
    %c1 = arith.constant 1 : index
    %5 = vector.load %arg1[%c0_6, %c0_7, %c1] : memref<2x4x342xf32, #tpu.memory_space<vmem>>, vector<1x4x288xf32>
    %6 = vector.shape_cast %5 : vector<1x4x288xf32> to vector<4x288xf32>
    %c4 = arith.constant 4 : index
    %c0_8 = arith.constant 0 : index
    %7 = vector.load %arg6[%c4, %c0_8] : memref<36x768xf32, #tpu.memory_space<vmem>>, vector<4x288xf32>
    tpu.vector_store %arg6[%c4, %c0_8], %6 {strides = array<i32>} : memref<36x768xf32, #tpu.memory_space<vmem>>, vector<4x288xf32>,
    %c0_9 = arith.constant 0 : index
    %c0_10 = arith.constant 0 : index
    %c2 = arith.constant 2 : index
    %8 = vector.load %arg1[%c0_9, %c0_10, %c2] : memref<2x4x342xf32, #tpu.memory_space<vmem>>, vector<1x4x288xf32>
    %9 = vector.shape_cast %8 : vector<1x4x288xf32> to vector<4x288xf32>
    %c8 = arith.constant 8 : index
    %c0_11 = arith.constant 0 : index
    %10 = vector.load %arg6[%c8, %c0_11] : memref<36x768xf32, #tpu.memory_space<vmem>>, vector<4x288xf32>
    tpu.vector_store %arg6[%c8, %c0_11], %9 {strides = array<i32>} : memref<36x768xf32, #tpu.memory_space<vmem>>, vector<4x288xf32>,
    %c0_12 = arith.constant 0 : index
    %c0_13 = arith.constant 0 : index
    %c18 = arith.constant 18 : index
    %11 = vector.load %arg1[%c0_12, %c0_13, %c18] : memref<2x4x342xf32, #tpu.memory_space<vmem>>, vector<1x4x288xf32>
    %12 = vector.shape_cast %11 : vector<1x4x288xf32> to vector<4x288xf32>
    %c12 = arith.constant 12 : index
    %c0_14 = arith.constant 0 : index
    %13 = vector.load %arg6[%c12, %c0_14] : memref<36x768xf32, #tpu.memory_space<vmem>>, vector<4x288xf32>
    tpu.vector_store %arg6[%c12, %c0_14], %12 {strides = array<i32>} : memref<36x768xf32, #tpu.memory_space<vmem>>, vector<4x288xf32>,
    %c0_15 = arith.constant 0 : index
    %c0_16 = arith.constant 0 : index
    %c19 = arith.constant 19 : index
    %14 = vector.load %arg1[%c0_15, %c0_16, %c19] : memref<2x4x342xf32, #tpu.memory_space<vmem>>, vector<1x4x288xf32>
    %15 = vector.shape_cast %14 : vector<1x4x288xf32> to vector<4x288xf32>
    %c16 = arith.constant 16 : index
    %c0_17 = arith.constant 0 : index
    %16 = vector.load %arg6[%c16, %c0_17] : memref<36x768xf32, #tpu.memory_space<vmem>>, vector<4x288xf32>
    tpu.vector_store %arg6[%c16, %c0_17], %15 {strides = array<i32>} : memref<36x768xf32, #tpu.memory_space<vmem>>, vector<4x288xf32>,
    %c0_18 = arith.constant 0 : index
    %c0_19 = arith.constant 0 : index
    %c20 = arith.constant 20 : index
    %17 = vector.load %arg1[%c0_18, %c0_19, %c20] : memref<2x4x342xf32, #tpu.memory_space<vmem>>, vector<1x4x288xf32>
    %18 = vector.shape_cast %17 : vector<1x4x288xf32> to vector<4x288xf32>
    %c20_20 = arith.constant 20 : index
    %c0_21 = arith.constant 0 : index
    %19 = vector.load %arg6[%c20_20, %c0_21] : memref<36x768xf32, #tpu.memory_space<vmem>>, vector<4x288xf32>
    tpu.vector_store %arg6[%c20_20, %c0_21], %18 {strides = array<i32>} : memref<36x768xf32, #tpu.memory_space<vmem>>, vector<4x288xf32>,
    %c0_22 = arith.constant 0 : index
    %c0_23 = arith.constant 0 : index
    %c36 = arith.constant 36 : index
    %20 = vector.load %arg1[%c0_22, %c0_23, %c36] : memref<2x4x342xf32, #tpu.memory_space<vmem>>, vector<1x4x288xf32>
    %21 = vector.shape_cast %20 : vector<1x4x288xf32> to vector<4x288xf32>
    %c24 = arith.constant 24 : index
    %c0_24 = arith.constant 0 : index
    %22 = vector.load %arg6[%c24, %c0_24] : memref<36x768xf32, #tpu.memory_space<vmem>>, vector<4x288xf32>
    tpu.vector_store %arg6[%c24, %c0_24], %21 {strides = array<i32>} : memref<36x768xf32, #tpu.memory_space<vmem>>, vector<4x288xf32>,
    %c0_25 = arith.constant 0 : index
    %c0_26 = arith.constant 0 : index
    %c37 = arith.constant 37 : index
    %23 = vector.load %arg1[%c0_25, %c0_26, %c37] : memref<2x4x342xf32, #tpu.memory_space<vmem>>, vector<1x4x288xf32>
    %24 = vector.shape_cast %23 : vector<1x4x288xf32> to vector<4x288xf32>
    %c28 = arith.constant 28 : index
    %c0_27 = arith.constant 0 : index
    %25 = vector.load %arg6[%c28, %c0_27] : memref<36x768xf32, #tpu.memory_space<vmem>>, vector<4x288xf32>
    tpu.vector_store %arg6[%c28, %c0_27], %24 {strides = array<i32>} : memref<36x768xf32, #tpu.memory_space<vmem>>, vector<4x288xf32>,
    %c0_28 = arith.constant 0 : index
    %c0_29 = arith.constant 0 : index
    %c38 = arith.constant 38 : index
    %26 = vector.load %arg1[%c0_28, %c0_29, %c38] : memref<2x4x342xf32, #tpu.memory_space<vmem>>, vector<1x4x288xf32>
    %27 = vector.shape_cast %26 : vector<1x4x288xf32> to vector<4x288xf32>
    %c32 = arith.constant 32 : index
    %c0_30 = arith.constant 0 : index
    %28 = vector.load %arg6[%c32, %c0_30] : memref<36x768xf32, #tpu.memory_space<vmem>>, vector<4x288xf32>
    tpu.vector_store %arg6[%c32, %c0_30], %27 {strides = array<i32>} : memref<36x768xf32, #tpu.memory_space<vmem>>, vector<4x288xf32>,
    %c1_31 = arith.constant 1 : index
    %c0_32 = arith.constant 0 : index
    %c0_33 = arith.constant 0 : index
    %29 = vector.load %arg1[%c1_31, %c0_32, %c0_33] : memref<2x4x342xf32, #tpu.memory_space<vmem>>, vector<1x4x288xf32>
    %30 = vector.shape_cast %29 : vector<1x4x288xf32> to vector<4x288xf32>
    %c0_34 = arith.constant 0 : index
    %c384 = arith.constant 384 : index
    %31 = vector.load %arg6[%c0_34, %c384] : memref<36x768xf32, #tpu.memory_space<vmem>>, vector<4x288xf32>
    tpu.vector_store %arg6[%c0_34, %c384], %30 {strides = array<i32>} : memref<36x768xf32, #tpu.memory_space<vmem>>, vector<4x288xf32>,
    %c1_35 = arith.constant 1 : index
    %c0_36 = arith.constant 0 : index
    %c1_37 = arith.constant 1 : index
    %32 = vector.load %arg1[%c1_35, %c0_36, %c1_37] : memref<2x4x342xf32, #tpu.memory_space<vmem>>, vector<1x4x288xf32>
    %33 = vector.shape_cast %32 : vector<1x4x288xf32> to vector<4x288xf32>
    %c4_38 = arith.constant 4 : index
    %c384_39 = arith.constant 384 : index
    %34 = vector.load %arg6[%c4_38, %c384_39] : memref<36x768xf32, #tpu.memory_space<vmem>>, vector<4x288xf32>
    tpu.vector_store %arg6[%c4_38, %c384_39], %33 {strides = array<i32>} : memref<36x768xf32, #tpu.memory_space<vmem>>, vector<4x288xf32>,
    %c1_40 = arith.constant 1 : index
    %c0_41 = arith.constant 0 : index
    %c2_42 = arith.constant 2 : index
    %35 = vector.load %arg1[%c1_40, %c0_41, %c2_42] : memref<2x4x342xf32, #tpu.memory_space<vmem>>, vector<1x4x288xf32>
    %36 = vector.shape_cast %35 : vector<1x4x288xf32> to vector<4x288xf32>
    %c8_43 = arith.constant 8 : index
    %c384_44 = arith.constant 384 : index
    %37 = vector.load %arg6[%c8_43, %c384_44] : memref<36x768xf32, #tpu.memory_space<vmem>>, vector<4x288xf32>
    tpu.vector_store %arg6[%c8_43, %c384_44], %36 {strides = array<i32>} : memref<36x768xf32, #tpu.memory_space<vmem>>, vector<4x288xf32>,
    %c1_45 = arith.constant 1 : index
    %c0_46 = arith.constant 0 : index
    %c18_47 = arith.constant 18 : index
    %38 = vector.load %arg1[%c1_45, %c0_46, %c18_47] : memref<2x4x342xf32, #tpu.memory_space<vmem>>, vector<1x4x288xf32>
    %39 = vector.shape_cast %38 : vector<1x4x288xf32> to vector<4x288xf32>
    %c12_48 = arith.constant 12 : index
    %c384_49 = arith.constant 384 : index
    %40 = vector.load %arg6[%c12_48, %c384_49] : memref<36x768xf32, #tpu.memory_space<vmem>>, vector<4x288xf32>
    tpu.vector_store %arg6[%c12_48, %c384_49], %39 {strides = array<i32>} : memref<36x768xf32, #tpu.memory_space<vmem>>, vector<4x288xf32>,
    %c1_50 = arith.constant 1 : index
    %c0_51 = arith.constant 0 : index
    %c19_52 = arith.constant 19 : index
    %41 = vector.load %arg1[%c1_50, %c0_51, %c19_52] : memref<2x4x342xf32, #tpu.memory_space<vmem>>, vector<1x4x288xf32>
    %42 = vector.shape_cast %41 : vector<1x4x288xf32> to vector<4x288xf32>
    %c16_53 = arith.constant 16 : index
    %c384_54 = arith.constant 384 : index
    %43 = vector.load %arg6[%c16_53, %c384_54] : memref<36x768xf32, #tpu.memory_space<vmem>>, vector<4x288xf32>
    tpu.vector_store %arg6[%c16_53, %c384_54], %42 {strides = array<i32>} : memref<36x768xf32, #tpu.memory_space<vmem>>, vector<4x288xf32>,
    %c1_55 = arith.constant 1 : index
    %c0_56 = arith.constant 0 : index
    %c20_57 = arith.constant 20 : index
    %44 = vector.load %arg1[%c1_55, %c0_56, %c20_57] : memref<2x4x342xf32, #tpu.memory_space<vmem>>, vector<1x4x288xf32>
    %45 = vector.shape_cast %44 : vector<1x4x288xf32> to vector<4x288xf32>
    %c20_58 = arith.constant 20 : index
    %c384_59 = arith.constant 384 : index
    %46 = vector.load %arg6[%c20_58, %c384_59] : memref<36x768xf32, #tpu.memory_space<vmem>>, vector<4x288xf32>
    tpu.vector_store %arg6[%c20_58, %c384_59], %45 {strides = array<i32>} : memref<36x768xf32, #tpu.memory_space<vmem>>, vector<4x288xf32>,
    %c1_60 = arith.constant 1 : index
    %c0_61 = arith.constant 0 : index
    %c36_62 = arith.constant 36 : index
    %47 = vector.load %arg1[%c1_60, %c0_61, %c36_62] : memref<2x4x342xf32, #tpu.memory_space<vmem>>, vector<1x4x288xf32>
    %48 = vector.shape_cast %47 : vector<1x4x288xf32> to vector<4x288xf32>
    %c24_63 = arith.constant 24 : index
    %c384_64 = arith.constant 384 : index
    %49 = vector.load %arg6[%c24_63, %c384_64] : memref<36x768xf32, #tpu.memory_space<vmem>>, vector<4x288xf32>
    tpu.vector_store %arg6[%c24_63, %c384_64], %48 {strides = array<i32>} : memref<36x768xf32, #tpu.memory_space<vmem>>, vector<4x288xf32>,
    %c1_65 = arith.constant 1 : index
    %c0_66 = arith.constant 0 : index
    %c37_67 = arith.constant 37 : index
    %50 = vector.load %arg1[%c1_65, %c0_66, %c37_67] : memref<2x4x342xf32, #tpu.memory_space<vmem>>, vector<1x4x288xf32>
    %51 = vector.shape_cast %50 : vector<1x4x288xf32> to vector<4x288xf32>
    %c28_68 = arith.constant 28 : index
    %c384_69 = arith.constant 384 : index
    %52 = vector.load %arg6[%c28_68, %c384_69] : memref<36x768xf32, #tpu.memory_space<vmem>>, vector<4x288xf32>
    tpu.vector_store %arg6[%c28_68, %c384_69], %51 {strides = array<i32>} : memref<36x768xf32, #tpu.memory_space<vmem>>, vector<4x288xf32>,
    %c1_70 = arith.constant 1 : index
    %c0_71 = arith.constant 0 : index
    %c38_72 = arith.constant 38 : index
    %53 = vector.load %arg1[%c1_70, %c0_71, %c38_72] : memref<2x4x342xf32, #tpu.memory_space<vmem>>, vector<1x4x288xf32>
    %54 = vector.shape_cast %53 : vector<1x4x288xf32> to vector<4x288xf32>
    %c32_73 = arith.constant 32 : index
    %c384_74 = arith.constant 384 : index
    %55 = vector.load %arg6[%c32_73, %c384_74] : memref<36x768xf32, #tpu.memory_space<vmem>>, vector<4x288xf32>
    tpu.vector_store %arg6[%c32_73, %c384_74], %54 {strides = array<i32>} : memref<36x768xf32, #tpu.memory_space<vmem>>, vector<4x288xf32>,
    %c0_75 = arith.constant 0 : index
    %c0_76 = arith.constant 0 : index
    %56 = vector.load %arg2[%c0_75, %c0_76] : memref<8x36xf32, #tpu.memory_space<vmem>>, vector<8x36xf32>
    %c0_77 = arith.constant 0 : index
    %c0_78 = arith.constant 0 : index
    %57 = vector.load %arg6[%c0_77, %c0_78] : memref<36x768xf32, #tpu.memory_space<vmem>>, vector<36x768xf32>
    %cst_79 = arith.constant dense<0.000000e+00> : vector<8x768xf32>
    %58 = tpu.matmul %56, %57, %cst_79 {dimension_numbers = #tpu.dot_dimension_numbers<[1], [0], [0], [1], [0, 0, 1, 1], [], []>} : vector<8x36xf32>, vector<36x768xf32>, vector<8x768xf32> -> vector<8x768xf32>
    %c0_80 = arith.constant 0 : index
    %c0_81 = arith.constant 0 : index
    %59 = vector.load %arg4[%c0_80, %c0_81] : memref<1x768xf32, #tpu.memory_space<vmem>>, vector<1x768xf32>
    %60 = vector.broadcast %59 : vector<1x768xf32> to vector<8x768xf32>
    %61 = arith.mulf %58, %60 : vector<8x768xf32>
    %cst_82 = arith.constant dense<0.000000e+00> : vector<8xf32>
    %62 = vector.multi_reduction <add>, %61, %cst_82 [1] : vector<8x768xf32> to vector<8xf32>
    %63 = vector.shape_cast %62 : vector<8xf32> to vector<8x1xf32>
    %cst_83 = arith.constant 0.001953125 : f32
    %64 = vector.broadcast %cst_83 : f32 to vector<8x1xf32>
    %65 = arith.mulf %63, %64 : vector<8x1xf32>
    %66 = vector.broadcast %65 : vector<8x1xf32> to vector<8x768xf32>
    %67 = arith.subf %58, %66 : vector<8x768xf32>
    %68 = vector.broadcast %59 : vector<1x768xf32> to vector<8x768xf32>
    %69 = arith.mulf %67, %68 : vector<8x768xf32>
    %70 = arith.mulf %69, %69 : vector<8x768xf32>
    %cst_84 = arith.constant dense<0.000000e+00> : vector<8xf32>
    %71 = vector.multi_reduction <add>, %70, %cst_84 [1] : vector<8x768xf32> to vector<8xf32>
    %72 = vector.shape_cast %71 : vector<8xf32> to vector<8x1xf32>
    %cst_85 = arith.constant 0.001953125 : f32
    %73 = vector.broadcast %cst_85 : f32 to vector<8x1xf32>
    %74 = arith.mulf %72, %73 : vector<8x1xf32>
    %c0_86 = arith.constant 0 : index
    %c0_87 = arith.constant 0 : index
    %75 = vector.load %arg3[%c0_86, %c0_87] : memref<8x2xf32, #tpu.memory_space<vmem>>, vector<8x1xf32>
    %cst_88 = arith.constant 9.99999974E-6 : f32
    %76 = vector.broadcast %cst_88 : f32 to vector<8x1xf32>
    %77 = arith.addf %74, %76 : vector<8x1xf32>
    %78 = math.rsqrt %77 : vector<8x1xf32>
    %79 = arith.mulf %75, %78 : vector<8x1xf32>
    %c0_89 = arith.constant 0 : index
    %c1_90 = arith.constant 1 : index
    %80 = vector.load %arg3[%c0_89, %c1_90] : memref<8x2xf32, #tpu.memory_space<vmem>>, vector<8x1xf32>
    %81 = vector.broadcast %79 : vector<8x1xf32> to vector<8x768xf32>
    %82 = arith.mulf %69, %81 : vector<8x768xf32>
    %83 = vector.broadcast %80 : vector<8x1xf32> to vector<8x768xf32>
    %84 = arith.addf %82, %83 : vector<8x768xf32>
    %cst_91 = arith.constant 0.000000e+00 : f32
    %85 = vector.broadcast %cst_91 : f32 to vector<8x768xf32>
    %86 = arith.maximumf %84, %85 : vector<8x768xf32>
    %87 = vector.extract_strided_slice %86 {offsets = [0, 0], sizes = [8, 16], strides = [1, 1]} : vector<8x768xf32> to vector<8x16xf32>
    %c0_92 = arith.constant 0 : index
    %c0_93 = arith.constant 0 : index
    %c0_94 = arith.constant 0 : index
    %88 = vector.load %arg5[%c0_92, %c0_93, %c0_94] : memref<2x8x256xf32, #tpu.memory_space<vmem>>, vector<1x8x16xf32>
    %89 = vector.shape_cast %88 : vector<1x8x16xf32> to vector<8x16xf32>
    %90 = vector.shape_cast %87 : vector<8x16xf32> to vector<1x8x16xf32>
    tpu.vector_store %arg5[%c0_92, %c0_93, %c0_94], %90 {strides = array<i32>} : memref<2x8x256xf32, #tpu.memory_space<vmem>>, vector<1x8x16xf32>,
    %91 = vector.extract_strided_slice %86 {offsets = [0, 18], sizes = [8, 16], strides = [1, 1]} : vector<8x768xf32> to vector<8x16xf32>
    %c0_95 = arith.constant 0 : index
    %c0_96 = arith.constant 0 : index
    %c16_97 = arith.constant 16 : index
    %92 = vector.load %arg5[%c0_95, %c0_96, %c16_97] : memref<2x8x256xf32, #tpu.memory_space<vmem>>, vector<1x8x16xf32>
    %93 = vector.shape_cast %92 : vector<1x8x16xf32> to vector<8x16xf32>
    %94 = vector.shape_cast %91 : vector<8x16xf32> to vector<1x8x16xf32>
    tpu.vector_store %arg5[%c0_95, %c0_96, %c16_97], %94 {strides = array<i32>} : memref<2x8x256xf32, #tpu.memory_space<vmem>>, vector<1x8x16xf32>,
    %95 = vector.extract_strided_slice %86 {offsets = [0, 36], sizes = [8, 16], strides = [1, 1]} : vector<8x768xf32> to vector<8x16xf32>
    %c0_98 = arith.constant 0 : index
    %c0_99 = arith.constant 0 : index
    %c32_100 = arith.constant 32 : index
    %96 = vector.load %arg5[%c0_98, %c0_99, %c32_100] : memref<2x8x256xf32, #tpu.memory_space<vmem>>, vector<1x8x16xf32>
    %97 = vector.shape_cast %96 : vector<1x8x16xf32> to vector<8x16xf32>
    %98 = vector.shape_cast %95 : vector<8x16xf32> to vector<1x8x16xf32>
    tpu.vector_store %arg5[%c0_98, %c0_99, %c32_100], %98 {strides = array<i32>} : memref<2x8x256xf32, #tpu.memory_space<vmem>>, vector<1x8x16xf32>,
    %99 = vector.extract_strided_slice %86 {offsets = [0, 54], sizes = [8, 16], strides = [1, 1]} : vector<8x768xf32> to vector<8x16xf32>
    %c0_101 = arith.constant 0 : index
    %c0_102 = arith.constant 0 : index
    %c48 = arith.constant 48 : index
    %100 = vector.load %arg5[%c0_101, %c0_102, %c48] : memref<2x8x256xf32, #tpu.memory_space<vmem>>, vector<1x8x16xf32>
    %101 = vector.shape_cast %100 : vector<1x8x16xf32> to vector<8x16xf32>
    %102 = vector.shape_cast %99 : vector<8x16xf32> to vector<1x8x16xf32>
    tpu.vector_store %arg5[%c0_101, %c0_102, %c48], %102 {strides = array<i32>} : memref<2x8x256xf32, #tpu.memory_space<vmem>>, vector<1x8x16xf32>,
    %103 = vector.extract_strided_slice %86 {offsets = [0, 72], sizes = [8, 16], strides = [1, 1]} : vector<8x768xf32> to vector<8x16xf32>
    %c0_103 = arith.constant 0 : index
    %c0_104 = arith.constant 0 : index
    %c64 = arith.constant 64 : index
    %104 = vector.load %arg5[%c0_103, %c0_104, %c64] : memref<2x8x256xf32, #tpu.memory_space<vmem>>, vector<1x8x16xf32>
    %105 = vector.shape_cast %104 : vector<1x8x16xf32> to vector<8x16xf32>
    %106 = vector.shape_cast %103 : vector<8x16xf32> to vector<1x8x16xf32>
    tpu.vector_store %arg5[%c0_103, %c0_104, %c64], %106 {strides = array<i32>} : memref<2x8x256xf32, #tpu.memory_space<vmem>>, vector<1x8x16xf32>,
    %107 = vector.extract_strided_slice %86 {offsets = [0, 90], sizes = [8, 16], strides = [1, 1]} : vector<8x768xf32> to vector<8x16xf32>
    %c0_105 = arith.constant 0 : index
    %c0_106 = arith.constant 0 : index
    %c80 = arith.constant 80 : index
    %108 = vector.load %arg5[%c0_105, %c0_106, %c80] : memref<2x8x256xf32, #tpu.memory_space<vmem>>, vector<1x8x16xf32>
    %109 = vector.shape_cast %108 : vector<1x8x16xf32> to vector<8x16xf32>
    %110 = vector.shape_cast %107 : vector<8x16xf32> to vector<1x8x16xf32>
    tpu.vector_store %arg5[%c0_105, %c0_106, %c80], %110 {strides = array<i32>} : memref<2x8x256xf32, #tpu.memory_space<vmem>>, vector<1x8x16xf32>,
    %111 = vector.extract_strided_slice %86 {offsets = [0, 108], sizes = [8, 16], strides = [1, 1]} : vector<8x768xf32> to vector<8x16xf32>
    %c0_107 = arith.constant 0 : index
    %c0_108 = arith.constant 0 : index
    %c96 = arith.constant 96 : index
    %112 = vector.load %arg5[%c0_107, %c0_108, %c96] : memref<2x8x256xf32, #tpu.memory_space<vmem>>, vector<1x8x16xf32>
    %113 = vector.shape_cast %112 : vector<1x8x16xf32> to vector<8x16xf32>
    %114 = vector.shape_cast %111 : vector<8x16xf32> to vector<1x8x16xf32>
    tpu.vector_store %arg5[%c0_107, %c0_108, %c96], %114 {strides = array<i32>} : memref<2x8x256xf32, #tpu.memory_space<vmem>>, vector<1x8x16xf32>,
    %115 = vector.extract_strided_slice %86 {offsets = [0, 126], sizes = [8, 16], strides = [1, 1]} : vector<8x768xf32> to vector<8x16xf32>
    %c0_109 = arith.constant 0 : index
    %c0_110 = arith.constant 0 : index
    %c112 = arith.constant 112 : index
    %116 = vector.load %arg5[%c0_109, %c0_110, %c112] : memref<2x8x256xf32, #tpu.memory_space<vmem>>, vector<1x8x16xf32>
    %117 = vector.shape_cast %116 : vector<1x8x16xf32> to vector<8x16xf32>
    %118 = vector.shape_cast %115 : vector<8x16xf32> to vector<1x8x16xf32>
    tpu.vector_store %arg5[%c0_109, %c0_110, %c112], %118 {strides = array<i32>} : memref<2x8x256xf32, #tpu.memory_space<vmem>>, vector<1x8x16xf32>,
    %119 = vector.extract_strided_slice %86 {offsets = [0, 144], sizes = [8, 16], strides = [1, 1]} : vector<8x768xf32> to vector<8x16xf32>
    %c0_111 = arith.constant 0 : index
    %c0_112 = arith.constant 0 : index
    %c128 = arith.constant 128 : index
    %120 = vector.load %arg5[%c0_111, %c0_112, %c128] : memref<2x8x256xf32, #tpu.memory_space<vmem>>, vector<1x8x16xf32>
    %121 = vector.shape_cast %120 : vector<1x8x16xf32> to vector<8x16xf32>
    %122 = vector.shape_cast %119 : vector<8x16xf32> to vector<1x8x16xf32>
    tpu.vector_store %arg5[%c0_111, %c0_112, %c128], %122 {strides = array<i32>} : memref<2x8x256xf32, #tpu.memory_space<vmem>>, vector<1x8x16xf32>,
    %123 = vector.extract_strided_slice %86 {offsets = [0, 162], sizes = [8, 16], strides = [1, 1]} : vector<8x768xf32> to vector<8x16xf32>
    %c0_113 = arith.constant 0 : index
    %c0_114 = arith.constant 0 : index
    %c144 = arith.constant 144 : index
    %124 = vector.load %arg5[%c0_113, %c0_114, %c144] : memref<2x8x256xf32, #tpu.memory_space<vmem>>, vector<1x8x16xf32>
    %125 = vector.shape_cast %124 : vector<1x8x16xf32> to vector<8x16xf32>
    %126 = vector.shape_cast %123 : vector<8x16xf32> to vector<1x8x16xf32>
    tpu.vector_store %arg5[%c0_113, %c0_114, %c144], %126 {strides = array<i32>} : memref<2x8x256xf32, #tpu.memory_space<vmem>>, vector<1x8x16xf32>,
    %127 = vector.extract_strided_slice %86 {offsets = [0, 180], sizes = [8, 16], strides = [1, 1]} : vector<8x768xf32> to vector<8x16xf32>
    %c0_115 = arith.constant 0 : index
    %c0_116 = arith.constant 0 : index
    %c160 = arith.constant 160 : index
    %128 = vector.load %arg5[%c0_115, %c0_116, %c160] : memref<2x8x256xf32, #tpu.memory_space<vmem>>, vector<1x8x16xf32>
    %129 = vector.shape_cast %128 : vector<1x8x16xf32> to vector<8x16xf32>
    %130 = vector.shape_cast %127 : vector<8x16xf32> to vector<1x8x16xf32>
    tpu.vector_store %arg5[%c0_115, %c0_116, %c160], %130 {strides = array<i32>} : memref<2x8x256xf32, #tpu.memory_space<vmem>>, vector<1x8x16xf32>,
    %131 = vector.extract_strided_slice %86 {offsets = [0, 198], sizes = [8, 16], strides = [1, 1]} : vector<8x768xf32> to vector<8x16xf32>
    %c0_117 = arith.constant 0 : index
    %c0_118 = arith.constant 0 : index
    %c176 = arith.constant 176 : index
    %132 = vector.load %arg5[%c0_117, %c0_118, %c176] : memref<2x8x256xf32, #tpu.memory_space<vmem>>, vector<1x8x16xf32>
    %133 = vector.shape_cast %132 : vector<1x8x16xf32> to vector<8x16xf32>
    %134 = vector.shape_cast %131 : vector<8x16xf32> to vector<1x8x16xf32>
    tpu.vector_store %arg5[%c0_117, %c0_118, %c176], %134 {strides = array<i32>} : memref<2x8x256xf32, #tpu.memory_space<vmem>>, vector<1x8x16xf32>,
    %135 = vector.extract_strided_slice %86 {offsets = [0, 216], sizes = [8, 16], strides = [1, 1]} : vector<8x768xf32> to vector<8x16xf32>
    %c0_119 = arith.constant 0 : index
    %c0_120 = arith.constant 0 : index
    %c192 = arith.constant 192 : index
    %136 = vector.load %arg5[%c0_119, %c0_120, %c192] : memref<2x8x256xf32, #tpu.memory_space<vmem>>, vector<1x8x16xf32>
    %137 = vector.shape_cast %136 : vector<1x8x16xf32> to vector<8x16xf32>
    %138 = vector.shape_cast %135 : vector<8x16xf32> to vector<1x8x16xf32>
    tpu.vector_store %arg5[%c0_119, %c0_120, %c192], %138 {strides = array<i32>} : memref<2x8x256xf32, #tpu.memory_space<vmem>>, vector<1x8x16xf32>,
    %139 = vector.extract_strided_slice %86 {offsets = [0, 234], sizes = [8, 16], strides = [1, 1]} : vector<8x768xf32> to vector<8x16xf32>
    %c0_121 = arith.constant 0 : index
    %c0_122 = arith.constant 0 : index
    %c208 = arith.constant 208 : index
    %140 = vector.load %arg5[%c0_121, %c0_122, %c208] : memref<2x8x256xf32, #tpu.memory_space<vmem>>, vector<1x8x16xf32>
    %141 = vector.shape_cast %140 : vector<1x8x16xf32> to vector<8x16xf32>
    %142 = vector.shape_cast %139 : vector<8x16xf32> to vector<1x8x16xf32>
    tpu.vector_store %arg5[%c0_121, %c0_122, %c208], %142 {strides = array<i32>} : memref<2x8x256xf32, #tpu.memory_space<vmem>>, vector<1x8x16xf32>,
    %143 = vector.extract_strided_slice %86 {offsets = [0, 252], sizes = [8, 16], strides = [1, 1]} : vector<8x768xf32> to vector<8x16xf32>
    %c0_123 = arith.constant 0 : index
    %c0_124 = arith.constant 0 : index
    %c224 = arith.constant 224 : index
    %144 = vector.load %arg5[%c0_123, %c0_124, %c224] : memref<2x8x256xf32, #tpu.memory_space<vmem>>, vector<1x8x16xf32>
    %145 = vector.shape_cast %144 : vector<1x8x16xf32> to vector<8x16xf32>
    %146 = vector.shape_cast %143 : vector<8x16xf32> to vector<1x8x16xf32>
    tpu.vector_store %arg5[%c0_123, %c0_124, %c224], %146 {strides = array<i32>} : memref<2x8x256xf32, #tpu.memory_space<vmem>>, vector<1x8x16xf32>,
    %147 = vector.extract_strided_slice %86 {offsets = [0, 270], sizes = [8, 16], strides = [1, 1]} : vector<8x768xf32> to vector<8x16xf32>
    %c0_125 = arith.constant 0 : index
    %c0_126 = arith.constant 0 : index
    %c240 = arith.constant 240 : index
    %148 = vector.load %arg5[%c0_125, %c0_126, %c240] : memref<2x8x256xf32, #tpu.memory_space<vmem>>, vector<1x8x16xf32>
    %149 = vector.shape_cast %148 : vector<1x8x16xf32> to vector<8x16xf32>
    %150 = vector.shape_cast %147 : vector<8x16xf32> to vector<1x8x16xf32>
    tpu.vector_store %arg5[%c0_125, %c0_126, %c240], %150 {strides = array<i32>} : memref<2x8x256xf32, #tpu.memory_space<vmem>>, vector<1x8x16xf32>,
    %151 = vector.extract_strided_slice %86 {offsets = [0, 384], sizes = [8, 16], strides = [1, 1]} : vector<8x768xf32> to vector<8x16xf32>
    %c1_127 = arith.constant 1 : index
    %c0_128 = arith.constant 0 : index
    %c0_129 = arith.constant 0 : index
    %152 = vector.load %arg5[%c1_127, %c0_128, %c0_129] : memref<2x8x256xf32, #tpu.memory_space<vmem>>, vector<1x8x16xf32>
    %153 = vector.shape_cast %152 : vector<1x8x16xf32> to vector<8x16xf32>
    %154 = vector.shape_cast %151 : vector<8x16xf32> to vector<1x8x16xf32>
    tpu.vector_store %arg5[%c1_127, %c0_128, %c0_129], %154 {strides = array<i32>} : memref<2x8x256xf32, #tpu.memory_space<vmem>>, vector<1x8x16xf32>,
    %155 = vector.extract_strided_slice %86 {offsets = [0, 402], sizes = [8, 16], strides = [1, 1]} : vector<8x768xf32> to vector<8x16xf32>
    %c1_130 = arith.constant 1 : index
    %c0_131 = arith.constant 0 : index
    %c16_132 = arith.constant 16 : index
    %156 = vector.load %arg5[%c1_130, %c0_131, %c16_132] : memref<2x8x256xf32, #tpu.memory_space<vmem>>, vector<1x8x16xf32>
    %157 = vector.shape_cast %156 : vector<1x8x16xf32> to vector<8x16xf32>
    %158 = vector.shape_cast %155 : vector<8x16xf32> to vector<1x8x16xf32>
    tpu.vector_store %arg5[%c1_130, %c0_131, %c16_132], %158 {strides = array<i32>} : memref<2x8x256xf32, #tpu.memory_space<vmem>>, vector<1x8x16xf32>,
    %159 = vector.extract_strided_slice %86 {offsets = [0, 420], sizes = [8, 16], strides = [1, 1]} : vector<8x768xf32> to vector<8x16xf32>
    %c1_133 = arith.constant 1 : index
    %c0_134 = arith.constant 0 : index
    %c32_135 = arith.constant 32 : index
    %160 = vector.load %arg5[%c1_133, %c0_134, %c32_135] : memref<2x8x256xf32, #tpu.memory_space<vmem>>, vector<1x8x16xf32>
    %161 = vector.shape_cast %160 : vector<1x8x16xf32> to vector<8x16xf32>
    %162 = vector.shape_cast %159 : vector<8x16xf32> to vector<1x8x16xf32>
    tpu.vector_store %arg5[%c1_133, %c0_134, %c32_135], %162 {strides = array<i32>} : memref<2x8x256xf32, #tpu.memory_space<vmem>>, vector<1x8x16xf32>,
    %163 = vector.extract_strided_slice %86 {offsets = [0, 438], sizes = [8, 16], strides = [1, 1]} : vector<8x768xf32> to vector<8x16xf32>
    %c1_136 = arith.constant 1 : index
    %c0_137 = arith.constant 0 : index
    %c48_138 = arith.constant 48 : index
    %164 = vector.load %arg5[%c1_136, %c0_137, %c48_138] : memref<2x8x256xf32, #tpu.memory_space<vmem>>, vector<1x8x16xf32>
    %165 = vector.shape_cast %164 : vector<1x8x16xf32> to vector<8x16xf32>
    %166 = vector.shape_cast %163 : vector<8x16xf32> to vector<1x8x16xf32>
    tpu.vector_store %arg5[%c1_136, %c0_137, %c48_138], %166 {strides = array<i32>} : memref<2x8x256xf32, #tpu.memory_space<vmem>>, vector<1x8x16xf32>,
    %167 = vector.extract_strided_slice %86 {offsets = [0, 456], sizes = [8, 16], strides = [1, 1]} : vector<8x768xf32> to vector<8x16xf32>
    %c1_139 = arith.constant 1 : index
    %c0_140 = arith.constant 0 : index
    %c64_141 = arith.constant 64 : index
    %168 = vector.load %arg5[%c1_139, %c0_140, %c64_141] : memref<2x8x256xf32, #tpu.memory_space<vmem>>, vector<1x8x16xf32>
    %169 = vector.shape_cast %168 : vector<1x8x16xf32> to vector<8x16xf32>
    %170 = vector.shape_cast %167 : vector<8x16xf32> to vector<1x8x16xf32>
    tpu.vector_store %arg5[%c1_139, %c0_140, %c64_141], %170 {strides = array<i32>} : memref<2x8x256xf32, #tpu.memory_space<vmem>>, vector<1x8x16xf32>,
    %171 = vector.extract_strided_slice %86 {offsets = [0, 474], sizes = [8, 16], strides = [1, 1]} : vector<8x768xf32> to vector<8x16xf32>
    %c1_142 = arith.constant 1 : index
    %c0_143 = arith.constant 0 : index
    %c80_144 = arith.constant 80 : index
    %172 = vector.load %arg5[%c1_142, %c0_143, %c80_144] : memref<2x8x256xf32, #tpu.memory_space<vmem>>, vector<1x8x16xf32>
    %173 = vector.shape_cast %172 : vector<1x8x16xf32> to vector<8x16xf32>
    %174 = vector.shape_cast %171 : vector<8x16xf32> to vector<1x8x16xf32>
    tpu.vector_store %arg5[%c1_142, %c0_143, %c80_144], %174 {strides = array<i32>} : memref<2x8x256xf32, #tpu.memory_space<vmem>>, vector<1x8x16xf32>,
    %175 = vector.extract_strided_slice %86 {offsets = [0, 492], sizes = [8, 16], strides = [1, 1]} : vector<8x768xf32> to vector<8x16xf32>
    %c1_145 = arith.constant 1 : index
    %c0_146 = arith.constant 0 : index
    %c96_147 = arith.constant 96 : index
    %176 = vector.load %arg5[%c1_145, %c0_146, %c96_147] : memref<2x8x256xf32, #tpu.memory_space<vmem>>, vector<1x8x16xf32>
    %177 = vector.shape_cast %176 : vector<1x8x16xf32> to vector<8x16xf32>
    %178 = vector.shape_cast %175 : vector<8x16xf32> to vector<1x8x16xf32>
    tpu.vector_store %arg5[%c1_145, %c0_146, %c96_147], %178 {strides = array<i32>} : memref<2x8x256xf32, #tpu.memory_space<vmem>>, vector<1x8x16xf32>,
    %179 = vector.extract_strided_slice %86 {offsets = [0, 510], sizes = [8, 16], strides = [1, 1]} : vector<8x768xf32> to vector<8x16xf32>
    %c1_148 = arith.constant 1 : index
    %c0_149 = arith.constant 0 : index
    %c112_150 = arith.constant 112 : index
    %180 = vector.load %arg5[%c1_148, %c0_149, %c112_150] : memref<2x8x256xf32, #tpu.memory_space<vmem>>, vector<1x8x16xf32>
    %181 = vector.shape_cast %180 : vector<1x8x16xf32> to vector<8x16xf32>
    %182 = vector.shape_cast %179 : vector<8x16xf32> to vector<1x8x16xf32>
    tpu.vector_store %arg5[%c1_148, %c0_149, %c112_150], %182 {strides = array<i32>} : memref<2x8x256xf32, #tpu.memory_space<vmem>>, vector<1x8x16xf32>,
    %183 = vector.extract_strided_slice %86 {offsets = [0, 528], sizes = [8, 16], strides = [1, 1]} : vector<8x768xf32> to vector<8x16xf32>
    %c1_151 = arith.constant 1 : index
    %c0_152 = arith.constant 0 : index
    %c128_153 = arith.constant 128 : index
    %184 = vector.load %arg5[%c1_151, %c0_152, %c128_153] : memref<2x8x256xf32, #tpu.memory_space<vmem>>, vector<1x8x16xf32>
    %185 = vector.shape_cast %184 : vector<1x8x16xf32> to vector<8x16xf32>
    %186 = vector.shape_cast %183 : vector<8x16xf32> to vector<1x8x16xf32>
    tpu.vector_store %arg5[%c1_151, %c0_152, %c128_153], %186 {strides = array<i32>} : memref<2x8x256xf32, #tpu.memory_space<vmem>>, vector<1x8x16xf32>,
    %187 = vector.extract_strided_slice %86 {offsets = [0, 546], sizes = [8, 16], strides = [1, 1]} : vector<8x768xf32> to vector<8x16xf32>
    %c1_154 = arith.constant 1 : index
    %c0_155 = arith.constant 0 : index
    %c144_156 = arith.constant 144 : index
    %188 = vector.load %arg5[%c1_154, %c0_155, %c144_156] : memref<2x8x256xf32, #tpu.memory_space<vmem>>, vector<1x8x16xf32>
    %189 = vector.shape_cast %188 : vector<1x8x16xf32> to vector<8x16xf32>
    %190 = vector.shape_cast %187 : vector<8x16xf32> to vector<1x8x16xf32>
    tpu.vector_store %arg5[%c1_154, %c0_155, %c144_156], %190 {strides = array<i32>} : memref<2x8x256xf32, #tpu.memory_space<vmem>>, vector<1x8x16xf32>,
    %191 = vector.extract_strided_slice %86 {offsets = [0, 564], sizes = [8, 16], strides = [1, 1]} : vector<8x768xf32> to vector<8x16xf32>
    %c1_157 = arith.constant 1 : index
    %c0_158 = arith.constant 0 : index
    %c160_159 = arith.constant 160 : index
    %192 = vector.load %arg5[%c1_157, %c0_158, %c160_159] : memref<2x8x256xf32, #tpu.memory_space<vmem>>, vector<1x8x16xf32>
    %193 = vector.shape_cast %192 : vector<1x8x16xf32> to vector<8x16xf32>
    %194 = vector.shape_cast %191 : vector<8x16xf32> to vector<1x8x16xf32>
    tpu.vector_store %arg5[%c1_157, %c0_158, %c160_159], %194 {strides = array<i32>} : memref<2x8x256xf32, #tpu.memory_space<vmem>>, vector<1x8x16xf32>,
    %195 = vector.extract_strided_slice %86 {offsets = [0, 582], sizes = [8, 16], strides = [1, 1]} : vector<8x768xf32> to vector<8x16xf32>
    %c1_160 = arith.constant 1 : index
    %c0_161 = arith.constant 0 : index
    %c176_162 = arith.constant 176 : index
    %196 = vector.load %arg5[%c1_160, %c0_161, %c176_162] : memref<2x8x256xf32, #tpu.memory_space<vmem>>, vector<1x8x16xf32>
    %197 = vector.shape_cast %196 : vector<1x8x16xf32> to vector<8x16xf32>
    %198 = vector.shape_cast %195 : vector<8x16xf32> to vector<1x8x16xf32>
    tpu.vector_store %arg5[%c1_160, %c0_161, %c176_162], %198 {strides = array<i32>} : memref<2x8x256xf32, #tpu.memory_space<vmem>>, vector<1x8x16xf32>,
    %199 = vector.extract_strided_slice %86 {offsets = [0, 600], sizes = [8, 16], strides = [1, 1]} : vector<8x768xf32> to vector<8x16xf32>
    %c1_163 = arith.constant 1 : index
    %c0_164 = arith.constant 0 : index
    %c192_165 = arith.constant 192 : index
    %200 = vector.load %arg5[%c1_163, %c0_164, %c192_165] : memref<2x8x256xf32, #tpu.memory_space<vmem>>, vector<1x8x16xf32>
    %201 = vector.shape_cast %200 : vector<1x8x16xf32> to vector<8x16xf32>
    %202 = vector.shape_cast %199 : vector<8x16xf32> to vector<1x8x16xf32>
    tpu.vector_store %arg5[%c1_163, %c0_164, %c192_165], %202 {strides = array<i32>} : memref<2x8x256xf32, #tpu.memory_space<vmem>>, vector<1x8x16xf32>,
    %203 = vector.extract_strided_slice %86 {offsets = [0, 618], sizes = [8, 16], strides = [1, 1]} : vector<8x768xf32> to vector<8x16xf32>
    %c1_166 = arith.constant 1 : index
    %c0_167 = arith.constant 0 : index
    %c208_168 = arith.constant 208 : index
    %204 = vector.load %arg5[%c1_166, %c0_167, %c208_168] : memref<2x8x256xf32, #tpu.memory_space<vmem>>, vector<1x8x16xf32>
    %205 = vector.shape_cast %204 : vector<1x8x16xf32> to vector<8x16xf32>
    %206 = vector.shape_cast %203 : vector<8x16xf32> to vector<1x8x16xf32>
    tpu.vector_store %arg5[%c1_166, %c0_167, %c208_168], %206 {strides = array<i32>} : memref<2x8x256xf32, #tpu.memory_space<vmem>>, vector<1x8x16xf32>,
    %207 = vector.extract_strided_slice %86 {offsets = [0, 636], sizes = [8, 16], strides = [1, 1]} : vector<8x768xf32> to vector<8x16xf32>
    %c1_169 = arith.constant 1 : index
    %c0_170 = arith.constant 0 : index
    %c224_171 = arith.constant 224 : index
    %208 = vector.load %arg5[%c1_169, %c0_170, %c224_171] : memref<2x8x256xf32, #tpu.memory_space<vmem>>, vector<1x8x16xf32>
    %209 = vector.shape_cast %208 : vector<1x8x16xf32> to vector<8x16xf32>
    %210 = vector.shape_cast %207 : vector<8x16xf32> to vector<1x8x16xf32>
    tpu.vector_store %arg5[%c1_169, %c0_170, %c224_171], %210 {strides = array<i32>} : memref<2x8x256xf32, #tpu.memory_space<vmem>>, vector<1x8x16xf32>,
    %211 = vector.extract_strided_slice %86 {offsets = [0, 654], sizes = [8, 16], strides = [1, 1]} : vector<8x768xf32> to vector<8x16xf32>
    %c1_172 = arith.constant 1 : index
    %c0_173 = arith.constant 0 : index
    %c240_174 = arith.constant 240 : index
    %212 = vector.load %arg5[%c1_172, %c0_173, %c240_174] : memref<2x8x256xf32, #tpu.memory_space<vmem>>, vector<1x8x16xf32>
    %213 = vector.shape_cast %212 : vector<1x8x16xf32> to vector<8x16xf32>
    %214 = vector.shape_cast %211 : vector<8x16xf32> to vector<1x8x16xf32>
    tpu.vector_store %arg5[%c1_172, %c0_173, %c240_174], %214 {strides = array<i32>} : memref<2x8x256xf32, #tpu.memory_space<vmem>>, vector<1x8x16xf32>,
    return
  }
  func.func @transform_0(%arg0: i32) -> (i32, i32, i32) {
    %c0_i32 = arith.constant 0 : i32
    %c0_i32_0 = arith.constant 0 : i32
    %c0_i32_1 = arith.constant 0 : i32
    %c0_i32_2 = arith.constant 0 : i32
    return %c0_i32, %c0_i32_0, %c0_i32_1 : i32, i32, i32
  }
  func.func @transform_1(%arg0: i32) -> (i32, i32) {
    %c0_i32 = arith.constant 0 : i32
    %c0_i32_0 = arith.constant 0 : i32
    %c0_i32_1 = arith.constant 0 : i32
    return %c0_i32, %c0_i32_0 : i32, i32
  }
  func.func @transform_2(%arg0: i32) -> (i32, i32) {
    %c0_i32 = arith.constant 0 : i32
    %c0_i32_0 = arith.constant 0 : i32
    %c0_i32_1 = arith.constant 0 : i32
    return %c0_i32, %c0_i32_0 : i32, i32
  }
  func.func @transform_3(%arg0: i32) -> (i32, i32) {
    %c0_i32 = arith.constant 0 : i32
    %c0_i32_0 = arith.constant 0 : i32
    %c0_i32_1 = arith.constant 0 : i32
    return %c0_i32, %c0_i32_0 : i32, i32
  }
  func.func @transform_4(%arg0: i32) -> (i32, i32, i32) {
    %c0_i32 = arith.constant 0 : i32
    %c0_i32_0 = arith.constant 0 : i32
    %c0_i32_1 = arith.constant 0 : i32
    %c0_i32_2 = arith.constant 0 : i32
    return %c0_i32, %c0_i32_0, %c0_i32_1 : i32, i32, i32
  }
}

</mosaic_0001>

<bundles_post_ra>
// kernel: block_conv_forward.1
= control target key start
LH: loop header
LB: loop body
LE: loop exit
PB: predicated region body
PF: predicated region fallthrough
CT: control target
= control target key end

     0   :  { %v1019_v2 = vmov 0.0   ;;  %s1020_s19 = smov 126   ;;  %s1021_s20 = smov 127   ;;  %vm54_vm0 = vcmask 257024   ;;  %vm89_vm1 = vcmask 1031168   ;;  %vm68_vm2 = vcmask 1039360   ;;  %s1462_s0 = inlined_call_operand.vmem [shape: f32[2,4,342], index: 0, kind: input, shape index: {}]   ;;  %s1463_s1 = inlined_call_operand.vmem [shape: f32[8,36], index: 1, kind: input, shape index: {}]   ;;  %s1464_s3 = inlined_call_operand.vmem [shape: f32[1,768], index: 3, kind: input, shape index: {}]   ;;  %s1465_s2 = inlined_call_operand.vmem [shape: f32[8,2], index: 2, kind: input, shape index: {}]   ;;  %s1466_s4 = inlined_call_operand.vmem [shape: f32[2,8,256], index: 4, kind: output, shape index: {}]  }
   0x1   :  { %v79_v0 = vld [vmem:[%s1462_s0 + $0x8] sm:$0xf]  ;;  %v1073_v1 = vld [vmem:[%s1462_s0] sm:$0xff]  ;;  %25 = vst [vmem:[#allocation2 + $0x40] sm:$0xff] %v1019_v2  ;;  %17 = vst [vmem:[#allocation2] sm:$0xff] %v1019_v2  ;;  %504 = vmatprep.mubr.f32.mxu0 %v1019_v2  ;;  %575 = vmatprep.mubr.f32.mxu1 %v1019_v2  ;;  %s1022_s27 = smov 110  }
   0x2   :  { %18 = vst [vmem:[#allocation2 + $0x8] sm:$0xff] %v1019_v2  ;;  %19 = vst [vmem:[#allocation2 + $0x10] sm:$0xff] %v1019_v2  ;;  %87 = vrot.lane.b32.xlu1 %v79_v0, %s1020_s19  ;;  %64 = vrot.lane.b32.xlu0 %v1073_v1, %s1021_s20  ;;  %v82_v3 = vcombine.high %v1073_v1, %v1073_v1  ;;  %v1007_v4 = vld [vmem:[%s1462_s0 + $0x8] ss:$0 sps:$4 sm:$0xff]   ;;  %v1119_v5 = vld [vmem:[%s1462_s0 + $0xc] sm:$0xff]  ;;  %v60_v8 = vcombine.low %v1073_v1, %v1073_v1  ;;  %s1023_s30 = smov 109  }
   0x3   :  { %20 = vst [vmem:[#allocation2 + $0x18] sm:$0xff] %v1019_v2  ;;  %21 = vst [vmem:[#allocation2 + $0x20] sm:$0xff] %v1019_v2  ;;  %v1008_v6 = vld [vmem:[%s1462_s0 + $0x8] ss:$0 sps:$4 sm:$0xff]   ;;  %v1128_v7 = vcombine.high %v1119_v5, %v1119_v5  ;;  %s1024_s7 = smov 108   ;;  %s1025_s10 = smov 92   ;;  %v234_v14 = vcombine.low %v1119_v5, %v1119_v5 }
   0x4   :  { %22 = vst [vmem:[#allocation2 + $0x28] sm:$0xff] %v1019_v2  ;;  %23 = vst [vmem:[#allocation2 + $0x30] sm:$0xff] %v1019_v2  ;;  %v48_v9 = vld [vmem:[%s1462_s0 + $0x8] sm:$0xf]  ;;  %s1026_s13 = smov 91   ;;  %s1027_s16 = smov 90  }
   0x5   :  { %24 = vst [vmem:[#allocation2 + $0x38] sm:$0xff] %v1019_v2  ;;  %26 = vst [vmem:[#allocation2 + $0x48] sm:$0xff] %v1019_v2  ;;  %v120_v10 = vld [vmem:[%s1462_s0 + $0x8] sm:$0xf]  ;;  %v913_v16 = vld [vmem:[%s1462_s0 + $0x14] sm:$0xf] }
   0x6   :  { %27 = vst [vmem:[#allocation2 + $0x50] sm:$0xff] %v1019_v2  ;;  %28 = vst [vmem:[#allocation2 + $0x58] sm:$0xff] %v1019_v2  ;;  %85 = vrot.lane.b32.xlu1 %v82_v3, %s1020_s19  ;;  %66 = vrot.lane.b32.xlu0 %v1007_v4, %s1021_s20  ;;  %v1009_v11 = vld [vmem:[%s1462_s0 + $0x8] ss:$0 sps:$4 sm:$0xff]   ;;  %v1013_v17 = vld [vmem:[%s1462_s0 + $0x14] ss:$0 sps:$4 sm:$0xff]  }
   0x7   :  { %29 = vst [vmem:[#allocation2 + $0x60] sm:$0xff] %v1019_v2  ;;  %30 = vst [vmem:[#allocation2 + $0x68] sm:$0xff] %v1019_v2  ;;  %v161_v12 = vld [vmem:[%s1462_s0 + $0x8] sm:$0xf]  ;;  %v917_v18 = vld [vmem:[%s1462_s0 + $0x14] sm:$0xf] }
   0x8   :  { %31 = vst [vmem:[#allocation2 + $0x70] sm:$0xff] %v1019_v2  ;;  %32 = vst [vmem:[#allocation2 + $0x78] sm:$0xff] %v1019_v2  ;;  %v1010_v13 = vld [vmem:[%s1462_s0 + $0x8] ss:$0 sps:$4 sm:$0xff]   ;;  %v1014_v19 = vld [vmem:[%s1462_s0 + $0x14] ss:$0 sps:$4 sm:$0xff]  }
   0x9   :  { %33 = vst [vmem:[#allocation2 + $0x80] sm:$0xff] %v1019_v2  ;;  %34 = vst [vmem:[#allocation2 + $0x88] sm:$0xff] %v1019_v2  ;;  %v202_v15 = vld [vmem:[%s1462_s0 + $0x8] sm:$0xf]  ;;  %v921_v20 = vld [vmem:[%s1462_s0 + $0x14] sm:$0xf] }
   0xa   :  { %35 = vst [vmem:[#allocation2 + $0x90] sm:$0xff] %v1019_v2  ;;  %36 = vst [vmem:[#allocation2 + $0x98] sm:$0xff] %v1019_v2  ;;  %108 = vrot.lane.b32.xlu1 %v1008_v6, %s1022_s27  ;;  %106 = vrot.lane.b32.xlu0 %v1073_v1, %s1022_s27  ;;  %v1015_v21 = vld [vmem:[%s1462_s0 + $0x14] ss:$0 sps:$4 sm:$0xff]   ;;  %vm76_vm3 = vcmask 261124   ;;  %vm110_vm4 = vcmask 900096  }
   0xb   :  { %37 = vst [vmem:[#allocation2 + $0xa0] sm:$0xff] %v1019_v2  ;;  %38 = vst [vmem:[#allocation2 + $0xa8] sm:$0xff] %v1019_v2  ;;  %v925_v22 = vld [vmem:[%s1462_s0 + $0x14] sm:$0xf]  ;;  %vm130_vm5 = vcmask 891904   ;;  %vm151_vm6 = vcmask 883712  }
   0xc   :  { %39 = vst [vmem:[#allocation2 + $0xb0] sm:$0xff] %v1019_v2  ;;  %40 = vst [vmem:[#allocation2 + $0xb8] sm:$0xff] %v1019_v2  ;;  %v1016_v23 = vld [vmem:[%s1462_s0 + $0x14] ss:$0 sps:$4 sm:$0xff]   ;;  %vm171_vm7 = vcmask 752640   ;;  %vm192_vm8 = vcmask 744448  }
   0xd   :  { %41 = vst [vmem:[#allocation2 + $0xc0] sm:$0xf] %v1019_v2  ;;  %42 = vst [vmem:[#allocation2 + $0xc8] sm:$0xf] %v1019_v2  ;;  %v929_v24 = vld [vmem:[%s1462_s0 + $0x14] sm:$0xf] }
   0xe   :  { %43 = vst [vmem:[#allocation2 + $0xd0] sm:$0xf] %v1019_v2  ;;  %44 = vst [vmem:[#allocation2 + $0xd8] sm:$0xf] %v1019_v2  ;;  %83 = vrot.lane.b32.xlu1 %v1073_v1, %s1020_s19  ;;  %62 = vrot.lane.b32.xlu0 %v60_v8, %s1021_s20  ;;  %vm212_vm9 = vcmask 736256   ;;  %vm421_vm10 = vcmask 1043456  }
   0xf   :  { %45 = vst [vmem:[#allocation2 + $0xe0] sm:$0xf] %v1019_v2  ;;  %46 = vst [vmem:[#allocation2 + $0xe8] sm:$0xf] %v1019_v2  ;;  %vm417_vm11 = vcmask 293888   ;;  %vm757_vm12 = vcmask 130048  }
  0x10   :  { %52 = vst [vmem:[#allocation2] sm:$0xf] %v1073_v1  ;;  %53 = vst [vmem:[#allocation2 + $0x8] sm:$0xf] %v82_v3  ;;  %s1030_s22 = smov 124   ;;  %s1031_s23 = smov 122  }
  0x11   :  { %227 = vst [vmem:[#allocation2 + $0x18] sm:$0xf] %v1119_v5  ;;  %228 = vst [vmem:[#allocation2 + $0x20] sm:$0xf] %v1128_v7  ;;  %s1032_s24 = smov 112   ;;  %s1033_s25 = smov 120  }
  0x12   :  { %55 = vst.msk [vmem:[#allocation2 + $0x10] sm:$0xf] %vm54_vm0, %v48_v9  ;;  %126 = vrot.lane.b32.xlu1 %v82_v3, %s1023_s30  ;;  %104 = vrot.lane.b32.xlu0 %v60_v8, %s1022_s27  ;;  %229 = vst.msk [vmem:[#allocation2 + $0x28] sm:$0xf] %vm54_vm0, %v913_v16  ;;  %s1034_s26 = smov 118   ;;  %s1035_s28 = smov 100  }
  0x13   :  { %s1036_s29 = smov 106   ;;  %s1037_s5 = smov 116   ;;  %vm763_vm13 = vcmask 261248   ;;  %vm768_vm14 = vcmask 392448   ;;  %vm773_vm15 = vcmask 523648  }
  0x14   :  { %s1038_s6 = smov 104  }
  0x16   :  { %147 = vrot.lane.b32.xlu1 %v1073_v1, %s1024_s7  ;;  %128 = vrot.lane.b32.xlu0 %v120_v10, %s1023_s30 }
  0x1a   :  { %167 = vrot.lane.b32.xlu1 %v82_v3, %s1025_s10  ;;  %149 = vrot.lane.b32.xlu0 %v1009_v11, %s1024_s7 }
  0x1e   :  { %188 = vrot.lane.b32.xlu1 %v1073_v1, %s1026_s13  ;;  %169 = vrot.lane.b32.xlu0 %v161_v12, %s1025_s10 }
  0x22   :  { %124 = vrot.lane.b32.xlu1 %v1073_v1, %s1023_s30  ;;  %190 = vrot.lane.b32.xlu0 %v1010_v13, %s1026_s13 }
  0x26   :  { %165 = vrot.lane.b32.xlu1 %v1073_v1, %s1025_s10  ;;  %145 = vrot.lane.b32.xlu0 %v60_v8, %s1024_s7 }
  0x2a   :  { %236 = vrot.lane.b32.xlu1 %v234_v14, %s1021_s20  ;;  %186 = vrot.lane.b32.xlu0 %v60_v8, %s1026_s13 }
  0x2e   :  { %255 = vrot.lane.b32.xlu1 %v1119_v5, %s1020_s19  ;;  %238 = vrot.lane.b32.xlu0 %v1119_v5, %s1021_s20 }
  0x32   :  { %275 = vrot.lane.b32.xlu1 %v234_v14, %s1022_s27  ;;  %257 = vrot.lane.b32.xlu0 %v1128_v7, %s1020_s19 }
  0x36   :  { %208 = vrot.lane.b32.xlu1 %v82_v3, %s1027_s16  ;;  %277 = vrot.lane.b32.xlu0 %v1119_v5, %s1022_s27 }
  0x3a   :  { %294 = vrot.lane.b32.xlu1 %v1119_v5, %s1023_s30  ;;  %210 = vrot.lane.b32.xlu0 %v202_v15, %s1027_s16 }
  0x3e   :  { %314 = vrot.lane.b32.xlu1 %v234_v14, %s1024_s7  ;;  %296 = vrot.lane.b32.xlu0 %v1128_v7, %s1023_s30 }
  0x42   :  { %333 = vrot.lane.b32.xlu1 %v1119_v5, %s1025_s10  ;;  %316 = vrot.lane.b32.xlu0 %v1119_v5, %s1024_s7 }
  0x46   :  { %353 = vrot.lane.b32.xlu1 %v234_v14, %s1026_s13  ;;  %335 = vrot.lane.b32.xlu0 %v1128_v7, %s1025_s10 }
  0x4a   :  { %206 = vrot.lane.b32.xlu1 %v1073_v1, %s1027_s16  ;;  %355 = vrot.lane.b32.xlu0 %v1119_v5, %s1026_s13 }
  0x4e   :  { %259 = vrot.lane.b32.xlu1 %v917_v18, %s1020_s19  ;;  %240 = vrot.lane.b32.xlu0 %v1013_v17, %s1021_s20 }
  0x52   :  { %298 = vrot.lane.b32.xlu1 %v921_v20, %s1023_s30  ;;  %279 = vrot.lane.b32.xlu0 %v1014_v19, %s1022_s27 }
  0x56   :  { %337 = vrot.lane.b32.xlu1 %v925_v22, %s1025_s10  ;;  %318 = vrot.lane.b32.xlu0 %v1015_v21, %s1024_s7 }
  0x5a   :  { %372 = vrot.lane.b32.xlu1 %v1119_v5, %s1027_s16  ;;  %357 = vrot.lane.b32.xlu0 %v1016_v23, %s1026_s13 }
  0x5e   :  { %376 = vrot.lane.b32.xlu1 %v929_v24, %s1027_s16  ;;  %374 = vrot.lane.b32.xlu0 %v1128_v7, %s1027_s16 }
  0x74   :  { %v88_v25 = vpop.permute.xlu1 %87  ;;  %v65_v26 = vpop.permute.xlu0 %64 }
  0x75   :  { %97 = vst.msk [vmem:[#allocation2 + $0x40] sm:$0xf] %vm54_vm0, %v88_v25 }
  0x78   :  { %v86_v27 = vpop.permute.xlu1 %85  ;;  %v67_v28 = vpop.permute.xlu0 %66 }
  0x79   :  { %v91_v29 = vsel %vm89_vm1, %v86_v27, %v88_v25  ;;  %v70_v30 = vsel %vm68_vm2, %v65_v26, %v67_v28  ;;  %77 = vst.msk [vmem:[#allocation2 + $0x10] sm:$0xf0] %vm76_vm3, %v67_v28 }
  0x7a   :  { %96 = vst [vmem:[#allocation2 + $0x38] sm:$0xf] %v91_v29  ;;  %75 = vst [vmem:[#allocation2 + $0x8] sm:$0xf0] %v70_v30 }
  0x7c   :  { %v109_v31 = vpop.permute.xlu1 %108  ;;  %v107_v32 = vpop.permute.xlu0 %106 }
  0x7d   :  { %118 = vst.msk [vmem:[#allocation2 + $0x40] sm:$0xf0] %vm76_vm3, %v109_v31  ;;  %v112_v33 = vsel %vm110_vm4, %v107_v32, %v109_v31 }
  0x7e   :  { %117 = vst [vmem:[#allocation2 + $0x38] sm:$0xf0] %v112_v33 }
  0x80   :  { %v84_v34 = vpop.permute.xlu1 %83  ;;  %v63_v35 = vpop.permute.xlu0 %62  ;;  %v389_v29 = vld [vmem:[#allocation2 + $0x10] sm:$0xff] }
  0x81   :  { %v90_v36 = vsel %vm89_vm1, %v84_v34, %v86_v27  ;;  %v69_v37 = vsel %vm68_vm2, %v63_v35, %v65_v26  ;;  %v388_v41 = vld [vmem:[#allocation2 + $0x8] sm:$0xff] }
  0x82   :  { %95 = vst [vmem:[#allocation2 + $0x30] sm:$0xf] %v90_v36  ;;  %74 = vst [vmem:[#allocation2] sm:$0xf0] %v69_v37 }
  0x84   :  { %v127_v38 = vpop.permute.xlu1 %126  ;;  %v105_v39 = vpop.permute.xlu0 %104  ;;  %v395_v24 = vld [vmem:[#allocation2 + $0x40] sm:$0xff] }
  0x85   :  { %v111_v40 = vsel %vm110_vm4, %v105_v39, %v107_v32  ;;  %v394_v42 = vld [vmem:[#allocation2 + $0x38] sm:$0xff]  ;;  %v965_v30 = vpack.c.bf16 %v395_v24, %v389_v29  ;;  %v653_v24 = vld [vmem:[%s1464_s3] sm:$0x3f] }
  0x86   :  { %116 = vst [vmem:[#allocation2 + $0x30] sm:$0xf0] %v111_v40  ;;  %v955_v43 = vpack.c.bf16 %v394_v42, %v388_v41 }
  0x88   :  { %v148_v44 = vpop.permute.xlu1 %147  ;;  %v129_v45 = vpop.permute.xlu0 %128  ;;  %956 = vmatprep.subr.bf16.mxu0 %v955_v43 }
  0x89   :  { %v132_v46 = vsel %vm130_vm5, %v127_v38, %v129_v45  ;;  %138 = vst.msk [vmem:[#allocation2 + $0x70] sm:$0xf] %vm54_vm0, %v129_v45  ;;  %v387_v50 = vld [vmem:[#allocation2] sm:$0xff] }
  0x8a   :  { %137 = vst [vmem:[#allocation2 + $0x68] sm:$0xf] %v132_v46 }
  0x8c   :  { %v168_v47 = vpop.permute.xlu1 %167  ;;  %v150_v48 = vpop.permute.xlu0 %149 }
  0x8d   :  { %v153_v49 = vsel %vm151_vm6, %v148_v44, %v150_v48  ;;  %159 = vst.msk [vmem:[#allocation2 + $0x70] sm:$0xf0] %vm76_vm3, %v150_v48  ;;  %v393_v51 = vld [vmem:[#allocation2 + $0x30] sm:$0xff] }
  0x8e   :  { %158 = vst [vmem:[#allocation2 + $0x68] sm:$0xf0] %v153_v49  ;;  %v957_v52 = vpack.c.bf16 %v393_v51, %v387_v50  ;;  %v1285_v49 = vld [vmem:[%s1463_s1] sm:$0xff] }
  0x90   :  { %v189_v53 = vpop.permute.xlu1 %188  ;;  %v170_v54 = vpop.permute.xlu0 %169  ;;  %958 = vmatpush1.bf16.msra.mxu0 %v957_v52 }
  0x91   :  { %v173_v55 = vsel %vm171_vm7, %v168_v47, %v170_v54  ;;  %179 = vst.msk [vmem:[#allocation2 + $0xa0] sm:$0xf] %vm54_vm0, %v170_v54 }
  0x92   :  { %178 = vst [vmem:[#allocation2 + $0x98] sm:$0xf] %v173_v55 }
  0x94   :  { %v125_v56 = vpop.permute.xlu1 %124  ;;  %v191_v57 = vpop.permute.xlu0 %190 }
  0x95   :  { %v131_v58 = vsel %vm130_vm5, %v125_v56, %v127_v38  ;;  %v194_v59 = vsel %vm192_vm8, %v189_v53, %v191_v57  ;;  %200 = vst.msk [vmem:[#allocation2 + $0xa0] sm:$0xf0] %vm76_vm3, %v191_v57  ;;  %v400_v4 = vld [vmem:[#allocation2 + $0x68] sm:$0xff]  ;;  %v401_v56 = vld [vmem:[#allocation2 + $0x70] sm:$0xff] }
  0x96   :  { %136 = vst [vmem:[#allocation2 + $0x60] sm:$0xf] %v131_v58  ;;  %199 = vst [vmem:[#allocation2 + $0x98] sm:$0xf0] %v194_v59 }
  0x98   :  { %v166_v60 = vpop.permute.xlu1 %165  ;;  %v146_v61 = vpop.permute.xlu0 %145 }
  0x99   :  { %v172_v62 = vsel %vm171_vm7, %v166_v60, %v168_v47  ;;  %v152_v63 = vsel %vm151_vm6, %v146_v61, %v148_v44 }
  0x9a   :  { %177 = vst [vmem:[#allocation2 + $0x90] sm:$0xf] %v172_v62  ;;  %157 = vst [vmem:[#allocation2 + $0x60] sm:$0xf0] %v152_v63 }
  0x9c   :  { %v237_v0 = vpop.permute.xlu1 %236  ;;  %v187_v1 = vpop.permute.xlu0 %186  ;;  %v407_v48 = vld [vmem:[#allocation2 + $0xa0] sm:$0xff] }
  0x9d   :  { %v193_v3 = vsel %vm192_vm8, %v187_v1, %v189_v53  ;;  %v406_v5 = vld [vmem:[#allocation2 + $0x98] sm:$0xff]  ;;  %v969_v57 = vpack.c.bf16 %v407_v48, %v401_v56 }
  0x9e   :  { %198 = vst [vmem:[#allocation2 + $0x90] sm:$0xf0] %v193_v3  ;;  %v959_v6 = vpack.c.bf16 %v406_v5, %v400_v4 }
  0xa0   :  { %v256_v7 = vpop.permute.xlu1 %255  ;;  %v239_v8 = vpop.permute.xlu0 %238  ;;  %960 = vmatprep.subr.bf16.mxu0 %v959_v6 }
  0xa1   :  { %v242_v9 = vsel %vm68_vm2, %v237_v0, %v239_v8  ;;  %v399_v13 = vld [vmem:[#allocation2 + $0x60] sm:$0xff] }
  0xa2   :  { %247 = vst [vmem:[#allocation2 + $0x18] sm:$0xf0] %v242_v9 }
  0xa4   :  { %v276_v10 = vpop.permute.xlu1 %275  ;;  %v258_v11 = vpop.permute.xlu0 %257 }
  0xa5   :  { %v261_v12 = vsel %vm89_vm1, %v256_v7, %v258_v11  ;;  %v405_v14 = vld [vmem:[#allocation2 + $0x90] sm:$0xff] }
  0xa6   :  { %266 = vst [vmem:[#allocation2 + $0x48] sm:$0xf] %v261_v12  ;;  %v961_v15 = vpack.c.bf16 %v405_v14, %v399_v13 }
  0xa8   :  { %v209_v16 = vpop.permute.xlu1 %208  ;;  %v278_v17 = vpop.permute.xlu0 %277  ;;  %962 = vmatpush1.bf16.msra.mxu0 %v961_v15 }
  0xa9   :  { %v281_v18 = vsel %vm110_vm4, %v276_v10, %v278_v17  ;;  %v390_v26 = vld [vmem:[#allocation2 + $0x18] sm:$0xff] }
  0xaa   :  { %286 = vst [vmem:[#allocation2 + $0x48] sm:$0xf0] %v281_v18 }
  0xac   :  { %v295_v19 = vpop.permute.xlu1 %294  ;;  %v211_v20 = vpop.permute.xlu0 %210 }
  0xad   :  { %v214_v21 = vsel %vm212_vm9, %v209_v16, %v211_v20  ;;  %220 = vst.msk [vmem:[#allocation2 + $0xd0] sm:$0xf] %vm54_vm0, %v211_v20 }
  0xae   :  { %219 = vst [vmem:[#allocation2 + $0xc8] sm:$0xf] %v214_v21  ;;  %v655_v21 = vlaneseq }
  0xb0   :  { %v315_v22 = vpop.permute.xlu1 %314  ;;  %v297_v23 = vpop.permute.xlu0 %296 }
  0xb1   :  { %v300_v25 = vsel %vm130_vm5, %v295_v19, %v297_v23  ;;  %v396_v27 = vld [vmem:[#allocation2 + $0x48] sm:$0xff] }
  0xb2   :  { %305 = vst [vmem:[#allocation2 + $0x78] sm:$0xf] %v300_v25  ;;  %v963_v28 = vpack.c.bf16 %v396_v27, %v390_v26 }
  0xb4   :  { %v334_v31 = vpop.permute.xlu1 %333  ;;  %964 = vmatprep.subr.bf16.mxu1 %v963_v28  ;;  %v317_v32 = vpop.permute.xlu0 %316  ;;  %v413_v19 = vld [vmem:[#allocation2 + $0xd0] sm:$0xf] }
  0xb5   :  { %v320_v33 = vsel %vm151_vm6, %v315_v22, %v317_v32  ;;  %966 = vmatpush1.bf16.msra.mxu1 %v965_v30  ;;  %v412_v34 = vld [vmem:[#allocation2 + $0xc8] sm:$0xf]  ;;  %v656_v22 = vshrl.u32 %v655_v21, 7 }
  0xb6   :  { %325 = vst [vmem:[#allocation2 + $0x78] sm:$0xf0] %v320_v33  ;;  %930 = vmatprep.subr.msk.mxu0 %vm421_vm10, %v412_v34 }
  0xb7   :  { %v661_v25 = vsub.s32 1, %v656_v22  ;;  %v665_v33 = vsub.s32 2, %v656_v22  ;;  %v669_v34 = vsub.s32 3, %v656_v22 }
  0xb8   :  { %v354_v35 = vpop.permute.xlu1 %353  ;;  %v336_v36 = vpop.permute.xlu0 %335 }
  0xb9   :  { %v339_v37 = vsel %vm171_vm7, %v334_v31, %v336_v36  ;;  %v662_v27 = vrot.slane %v653_v24, %v661_v25 }
  0xba   :  { %344 = vst [vmem:[#allocation2 + $0xa8] sm:$0xf] %v339_v37  ;;  %v670_v37 = vrot.slane %v653_v24, %v669_v34 }
  0xbc   :  { %v207_v38 = vpop.permute.xlu1 %206  ;;  %v356_v39 = vpop.permute.xlu0 %355 }
  0xbd   :  { %v213_v40 = vsel %vm212_vm9, %v207_v38, %v209_v16  ;;  %v359_v41 = vsel %vm192_vm8, %v354_v35, %v356_v39  ;;  %v402_v53 = vld [vmem:[#allocation2 + $0x78] sm:$0xff]  ;;  %v673_v35 = vsub.s32 4, %v656_v22 }
  0xbe   :  { %218 = vst [vmem:[#allocation2 + $0xc0] sm:$0xf] %v213_v40  ;;  %364 = vst [vmem:[#allocation2 + $0xa8] sm:$0xf0] %v359_v41 }
  0xbf   :  { %v674_v38 = vrot.slane %v653_v24, %v673_v35 }
  0xc0   :  { %v260_v42 = vpop.permute.xlu1 %259  ;;  %v241_v43 = vpop.permute.xlu0 %240 }
  0xc1   :  { %v262_v44 = vsel %vm89_vm1, %v258_v11, %v260_v42  ;;  %268 = vst.msk [vmem:[#allocation2 + $0x58] sm:$0xf] %vm54_vm0, %v260_v42  ;;  %v243_v45 = vsel %vm68_vm2, %v239_v8, %v241_v43  ;;  %vm783_vm1 = vcmask 786048   ;;  %vm788_vm2 = vcmask 917248  }
  0xc2   :  { %249 = vst.msk [vmem:[#allocation2 + $0x28] sm:$0xf0] %vm76_vm3, %v241_v43  ;;  %267 = vst [vmem:[#allocation2 + $0x50] sm:$0xf] %v262_v44 }
  0xc3   :  { %248 = vst [vmem:[#allocation2 + $0x20] sm:$0xf0] %v243_v45 }
  0xc4   :  { %v299_v46 = vpop.permute.xlu1 %298  ;;  %v280_v47 = vpop.permute.xlu0 %279 }
  0xc5   :  { %v301_v50 = vsel %vm130_vm5, %v297_v23, %v299_v46  ;;  %307 = vst.msk [vmem:[#allocation2 + $0x88] sm:$0xf] %vm54_vm0, %v299_v46  ;;  %v282_v51 = vsel %vm110_vm4, %v278_v17, %v280_v47  ;;  %v411_v52 = vld [vmem:[#allocation2 + $0xc0] sm:$0xf]  ;;  %v408_v54 = vld [vmem:[#allocation2 + $0xa8] sm:$0xff]  ;;  %v657_v23 = vsub.s32 0, %v656_v22 }
  0xc6   :  { %288 = vst.msk [vmem:[#allocation2 + $0x58] sm:$0xf0] %vm76_vm3, %v280_v47  ;;  %306 = vst [vmem:[#allocation2 + $0x80] sm:$0xf] %v301_v50  ;;  %931 = vmatpush1.msk.msra.mxu0 %vm421_vm10, %v411_v52  ;;  %v967_v55 = vpack.c.bf16 %v408_v54, %v402_v53  ;;  %vm798_vm4 = vcmask 1048448   ;;  %vm795_vm5 = vcmask 932864  }
  0xc7   :  { %287 = vst [vmem:[#allocation2 + $0x50] sm:$0xf0] %v282_v51  ;;  %932 = vmatmul.mubr.msk.f32.vlgmr.msra.gmra.mrb[0].mxu0 %vm417_vm11, %v1285_v49  ;;  %v658_v26 = vrot.slane %v653_v24, %v657_v23 }
  0xc8   :  { %v338_v58 = vpop.permute.xlu1 %337  ;;  %v319_v59 = vpop.permute.xlu0 %318  ;;  %968 = vmatprep.subr.bf16.mxu1 %v967_v55  ;;  %646 = vmatprep.mubr.f32.mxu0 %v1019_v2 }
  0xc9   :  { %v340_v60 = vsel %vm171_vm7, %v336_v36, %v338_v58  ;;  %346 = vst.msk [vmem:[#allocation2 + $0xb8] sm:$0xf] %vm54_vm0, %v338_v58  ;;  %v321_v61 = vsel %vm151_vm6, %v317_v32, %v319_v59  ;;  %970 = vmatpush1.bf16.msra.mxu1 %v969_v57  ;;  %v392_v0 = vld [vmem:[#allocation2 + $0x28] sm:$0xff]  ;;  %v666_v36 = vrot.slane %v653_v24, %v665_v33 }
  0xca   :  { %327 = vst.msk [vmem:[#allocation2 + $0x88] sm:$0xf0] %vm76_vm3, %v319_v59  ;;  %345 = vst [vmem:[#allocation2 + $0xb0] sm:$0xf] %v340_v60  ;;  %v391_v4 = vld [vmem:[#allocation2 + $0x20] sm:$0xff] }
  0xcb   :  { %326 = vst [vmem:[#allocation2 + $0x80] sm:$0xf0] %v321_v61 }
  0xcc   :  { %v373_v62 = vpop.permute.xlu1 %372  ;;  %v358_v63 = vpop.permute.xlu0 %357 }
  0xcd   :  { %v398_v1 = vld [vmem:[#allocation2 + $0x58] sm:$0xff]  ;;  %v360_v3 = vsel %vm192_vm8, %v356_v39, %v358_v63  ;;  %366 = vst.msk [vmem:[#allocation2 + $0xb8] sm:$0xf0] %vm76_vm3, %v358_v63  ;;  %v677_v39 = vsub.s32 5, %v656_v22  ;;  %vm829_vm3 = vcmask 818176  }
  0xce   :  { %v971_v2 = vpack.c.bf16 %v398_v1, %v392_v0  ;;  %v397_v5 = vld [vmem:[#allocation2 + $0x50] sm:$0xff]  ;;  %365 = vst [vmem:[#allocation2 + $0xb0] sm:$0xf0] %v360_v3 }
  0xcf   :  { %v973_v6 = vpack.c.bf16 %v397_v5, %v391_v4  ;;  %v678_v48 = vrot.slane %v653_v24, %v677_v39 }
  0xd0   :  { %972 = vmatprep.subr.bf16.mxu0 %v971_v2  ;;  %v377_v7 = vpop.permute.xlu1 %376  ;;  %v375_v8 = vpop.permute.xlu0 %374 }
  0xd1   :  { %974 = vmatpush1.bf16.msra.mxu0 %v973_v6  ;;  %385 = vst.msk [vmem:[#allocation2 + $0xe8] sm:$0xf] %vm54_vm0, %v377_v7  ;;  %v378_v9 = vsel %vm212_vm9, %v373_v62, %v375_v8  ;;  %v379_v10 = vsel %vm212_vm9, %v375_v8, %v377_v7  ;;  %v404_v11 = vld [vmem:[#allocation2 + $0x88] sm:$0xff]  ;;  %vm778_vm0 = vcmask 654848  }
  0xd2   :  { %383 = vst [vmem:[#allocation2 + $0xd8] sm:$0xf] %v378_v9  ;;  %384 = vst [vmem:[#allocation2 + $0xe0] sm:$0xf] %v379_v10  ;;  %v403_v14 = vld [vmem:[#allocation2 + $0x80] sm:$0xff] }
  0xd4   :  { %v410_v12 = vld [vmem:[#allocation2 + $0xb8] sm:$0xff] }
  0xd5   :  { %v975_v13 = vpack.c.bf16 %v410_v12, %v404_v11  ;;  %v409_v15 = vld [vmem:[#allocation2 + $0xb0] sm:$0xff] }
  0xd6   :  { %v977_v16 = vpack.c.bf16 %v409_v15, %v403_v14  ;;  %v1028_v14 = vmov 0   ;;  %v725_v15 = vld [vmem:[%s1465_s2] sm:$0xff] }
  0xd7   :  { %976 = vmatprep.subr.bf16.mxu0 %v975_v13  ;;  %1002 = vset.pattern.permute.xlu0 %v1028_v14 }
  0xd8   :  { %978 = vmatpush1.bf16.msra.mxu0 %v977_v16  ;;  %v416_v17 = vld [vmem:[#allocation2 + $0xe8] sm:$0xf]  ;;  %v1029_v16 = vmov 1  }
  0xd9   :  { %v414_v18 = vld [vmem:[#allocation2 + $0xd8] sm:$0xf]  ;;  %936 = vmatprep.subr.msk.mxu0 %vm421_vm10, %v416_v17  ;;  %v415_v20 = vld [vmem:[#allocation2 + $0xe0] sm:$0xf]  ;;  %1003 = vset.pattern.permute.xlu1 %v1029_v16 }
  0xda   :  { %933 = vmatprep.subr.msk.mxu1 %vm421_vm10, %v414_v18 }
  0xdb   :  { %934 = vmatpush1.msk.msra.mxu1 %vm421_vm10, %v413_v19 }
  0xdc   :  { %935 = vmatmul.mubr.msk.f32.vlgmr.msra.gmra.mrb[0].mxu1 %vm417_vm11, %v1285_v49  ;;  %937 = vmatpush1.msk.msra.mxu0 %vm421_vm10, %v415_v20 }
  0xdd   :  { %938 = vmatmul.mubr.msk.f32.vlgmr.msra.gmra.mrb[2].mxu0 %vm417_vm11, %v1285_v49 }
 0x19a   :  { %v506_v28 = vpop.f32.mrb[0].mxu0 }
 0x19b   :  { %v685_v29 = vmul.f32 %v658_v26, %v506_v28  ;;  %v508_v30 = vpop.f32.mrb[1].mxu0 }
 0x19c   :  { %v686_v31 = vmul.f32 %v662_v27, %v508_v30 }
 0x19e   :  { %v691_v32 = vadd.f32 %v686_v31, %v685_v29 }
 0x1af   :  { %v577_v40 = vpop.f32.mrb[0].mxu1 }
 0x1b0   :  { %v687_v41 = vmul.f32 %v666_v36, %v577_v40  ;;  %v579_v42 = vpop.f32.mrb[1].mxu1  ;;  %v648_v43 = vpop.f32.mrb[2].mxu0 }
 0x1b1   :  { %v688_v44 = vmul.f32 %v670_v37, %v579_v42  ;;  %v650_v45 = vpop.f32.mrb[3].mxu0  ;;  %v689_v47 = vmul.f32 %v674_v38, %v648_v43 }
 0x1b2   :  { %v692_v46 = vadd.f32 %v691_v32, %v687_v41  ;;  %v690_v50 = vmul.f32 %v678_v48, %v650_v45 }
 0x1b4   :  { %v693_v49 = vadd.f32 %v692_v46, %v688_v44 }
 0x1b6   :  { %v694_v51 = vadd.f32 %v693_v49, %v689_v47 }
 0x1b8   :  { %v695_v52 = vadd.f32 %v694_v51, %v690_v50 }
 0x1ba   :  { %696 = vadd.xlane.f32.xlu0 %v695_v52 }
 0x247   :  { %v697_v53 = vpop.xlane.xlu0 %696 }
 0x248   :  { %v698_v54 = vmul.f32 0.001953125, %v697_v53 }
 0x24a   :  { %v699_v55 = vsub.f32 %v506_v28, %v698_v54  ;;  %v700_v56 = vsub.f32 %v508_v30, %v698_v54  ;;  %v701_v57 = vsub.f32 %v577_v40, %v698_v54  ;;  %v702_v58 = vsub.f32 %v579_v42, %v698_v54 }
 0x24b   :  { %v703_v59 = vsub.f32 %v648_v43, %v698_v54  ;;  %v704_v63 = vsub.f32 %v650_v45, %v698_v54 }
 0x24c   :  { %v705_v60 = vmul.f32 %v699_v55, %v658_v26  ;;  %v706_v61 = vmul.f32 %v700_v56, %v662_v27  ;;  %v1315_v62 = vmul.f32 %v701_v57, %v666_v36  ;;  %v708_v0 = vmul.f32 %v702_v58, %v670_v37 }
 0x24d   :  { %v709_v2 = vmul.f32 %v703_v59, %v674_v38  ;;  %v1319_v6 = vmul.f32 %v704_v63, %v678_v48 }
 0x24e   :  { %v711_v1 = vmul.f32 %v705_v60, %v705_v60  ;;  %v712_v3 = vmul.f32 %v706_v61, %v706_v61  ;;  %v713_v4 = vmul.f32 %v1315_v62, %v1315_v62  ;;  %v714_v7 = vmul.f32 %v708_v0, %v708_v0 }
 0x24f   :  { %v715_v9 = vmul.f32 %v709_v2, %v709_v2  ;;  %v716_v11 = vmul.f32 %v1319_v6, %v1319_v6 }
 0x250   :  { %v717_v5 = vadd.f32 %v712_v3, %v711_v1 }
 0x252   :  { %v718_v8 = vadd.f32 %v717_v5, %v713_v4 }
 0x254   :  { %v719_v10 = vadd.f32 %v718_v8, %v714_v7 }
 0x256   :  { %v720_v12 = vadd.f32 %v719_v10, %v715_v9 }
 0x258   :  { %v721_v13 = vadd.f32 %v720_v12, %v716_v11 }
 0x25a   :  { %722 = vadd.xlane.f32.xlu1 %v721_v13 }
 0x26b   :  { %742 = vperm.xlu1 %1003, %v725_v15  }
 0x2e7   :  { %v723_v17 = vpop.xlane.xlu1 %722 }
 0x2e8   :  { %v724_v18 = vmul.f32 0.001953125, %v723_v17 }
 0x2ea   :  { %v726_v19 = vadd.f32 1e-05, %v724_v18 }
 0x2eb   :  { %v743_v23 = vpop.permute.xlu1 %742 }
 0x2ec   :  { %1017 = vrsqrt.f32 %v726_v19 }
 0x2f6   :  { %v1018_v20 = vpop.eup %1017 }
 0x2f7   :  { %v728_v21 = vmul.f32 %v1018_v20, %v725_v15 }
 0x2f9   :  { %731 = vperm.xlu0 %1002, %v728_v21  }
 0x2fd   :  { %1004 = vset.pattern.permute.xlu0 %v1029_v16 }
 0x378   :  { %v732_v22 = vpop.permute.xlu0 %731 }
 0x379   :  { %v734_v24 = vmul.f32 %v732_v22, %v705_v60  ;;  %v737_v25 = vmul.f32 %v732_v22, %v708_v0  ;;  %v738_v26 = vmul.f32 %v732_v22, %v709_v2  ;;  %v735_v30 = vmul.f32 %v732_v22, %v706_v61 }
 0x37a   :  { %v736_v36 = vmul.f32 %v732_v22, %v1315_v62  ;;  %v739_v39 = vmul.f32 %v732_v22, %v1319_v6 }
 0x37b   :  { %v745_v27 = vadd.f32 %v743_v23, %v734_v24  ;;  %v748_v28 = vadd.f32 %v743_v23, %v737_v25  ;;  %v749_v29 = vadd.f32 %v743_v23, %v738_v26  ;;  %v746_v34 = vadd.f32 %v743_v23, %v735_v30 }
 0x37c   :  { %v747_v37 = vadd.f32 %v743_v23, %v736_v36  ;;  %v750_v40 = vadd.f32 %v743_v23, %v739_v39 }
 0x37d   :  { %v751_v31 = vmax.f32 %v745_v27, 0.0  ;;  %v754_v32 = vmax.f32 %v748_v28, 0.0  ;;  %v755_v33 = vmax.f32 %v749_v29, 0.0  ;;  %v752_v35 = vmax.f32 %v746_v34, 0.0 }
 0x37e   :  { %v753_v38 = vmax.f32 %v747_v37, 0.0  ;;  %v756_v41 = vmax.f32 %v750_v40, 0.0 }
 0x37f   :  { %876 = vrot.lane.b32.xlu0 %v755_v33, %s1022_s27  ;;  %760 = vrot.lane.b32.xlu1 %v751_v31, %s1020_s19  ;;  %758 = vst.msk [vmem:[%s1466_s4] sm:$0xff] %vm757_vm12, %v751_v31  ;;  %939 = vst.msk [vmem:[%s1466_s4 + $0x10] sm:$0xff] %vm757_vm12, %v754_v32 }
 0x383   :  { %844 = vrot.lane.b32.xlu0 %v754_v32, %s1030_s22  ;;  %765 = vrot.lane.b32.xlu1 %v751_v31, %s1030_s22 }
 0x387   :  { %770 = vrot.lane.b32.xlu0 %v751_v31, %s1031_s23  ;;  %800 = vrot.lane.b32.xlu1 %v752_v35, %s1032_s24 }
 0x38b   :  { %848 = vrot.lane.b32.xlu0 %v754_v32, %s1031_s23  ;;  %872 = vrot.lane.b32.xlu1 %v755_v33, %s1032_s24 }
 0x38f   :  { %775 = vrot.lane.b32.xlu0 %v751_v31, %s1033_s25  ;;  %804 = vrot.lane.b32.xlu1 %v752_v35, %s1022_s27  ;;  %s1040_s27 = smov 102  }
 0x393   :  { %852 = vrot.lane.b32.xlu0 %v754_v32, %s1033_s25  ;;  %840 = vrot.lane.b32.xlu1 %v754_v32, %s1020_s19  ;;  %s1039_s19 = smov 114  }
 0x397   :  { %780 = vrot.lane.b32.xlu0 %v751_v31, %s1034_s26  ;;  %808 = vrot.lane.b32.xlu1 %v752_v35, %s1024_s7 }
 0x39b   :  { %825 = vrot.lane.b32.xlu0 %v752_v35, %s1035_s28  ;;  %880 = vrot.lane.b32.xlu1 %v755_v33, %s1024_s7  ;;  %s1041_s7 = smov 98  }
 0x39f   :  { %856 = vrot.lane.b32.xlu0 %v754_v32, %s1034_s26  ;;  %812 = vrot.lane.b32.xlu1 %v752_v35, %s1036_s29 }
 0x3a3   :  { %897 = vrot.lane.b32.xlu0 %v755_v33, %s1035_s28  ;;  %884 = vrot.lane.b32.xlu1 %v755_v33, %s1036_s29 }
 0x3a7   :  { %785 = vrot.lane.b32.xlu0 %v751_v31, %s1037_s5  ;;  %816 = vrot.lane.b32.xlu1 %v752_v35, %s1038_s6 }
 0x3ab   :  { %793 = vrot.lane.b32.xlu0 %v752_v35, %s1039_s19  ;;  %888 = vrot.lane.b32.xlu1 %v755_v33, %s1038_s6 }
 0x3af   :  { %865 = vrot.lane.b32.xlu0 %v754_v32, %s1039_s19  ;;  %820 = vrot.lane.b32.xlu1 %v752_v35, %s1040_s27 }
 0x3b3   :  { %833 = vrot.lane.b32.xlu0 %v753_v38, %s1041_s7  ;;  %827 = vrot.lane.b32.xlu1 %v753_v38, %s1035_s28 }
 0x3b7   :  { %892 = vrot.lane.b32.xlu1 %v755_v33, %s1040_s27 }
 0x3bb   :  { %899 = vrot.lane.b32.xlu1 %v756_v41, %s1035_s28 }
 0x3bf   :  { %791 = vrot.lane.b32.xlu1 %v751_v31, %s1039_s19 }
 0x3c3   :  { %860 = vrot.lane.b32.xlu1 %v754_v32, %s1037_s5 }
 0x3c7   :  { %867 = vrot.lane.b32.xlu1 %v755_v33, %s1039_s19 }
 0x3cb   :  { %904 = vrot.lane.b32.xlu1 %v756_v41, %s1041_s7 }
 0x3f1   :  { %v877_v42 = vpop.permute.xlu0 %876  ;;  %v761_v43 = vpop.permute.xlu1 %760 }
 0x3f2   :  { %764 = vst.msk [vmem:[%s1466_s4] sm:$0xff] %vm763_vm13, %v761_v43 }
 0x3f5   :  { %v845_v44 = vpop.permute.xlu0 %844  ;;  %v766_v45 = vpop.permute.xlu1 %765 }
 0x3f6   :  { %769 = vst.msk [vmem:[%s1466_s4] sm:$0xff] %vm768_vm14, %v766_v45 }
 0x3f9   :  { %v771_v46 = vpop.permute.xlu0 %770  ;;  %v801_v47 = vpop.permute.xlu1 %800 }
 0x3fa   :  { %774 = vst.msk [vmem:[%s1466_s4] sm:$0xff] %vm773_vm15, %v771_v46 }
 0x3fb   :  { %803 = vst.msk [vmem:[%s1466_s4 + $0x8] sm:$0xff] %vm757_vm12, %v801_v47 }
 0x3fd   :  { %v849_v48 = vpop.permute.xlu0 %848  ;;  %v873_v49 = vpop.permute.xlu1 %872 }
 0x3fe   :  { %947 = vst.msk [vmem:[%s1466_s4 + $0x18] sm:$0xff] %vm757_vm12, %v873_v49 }
 0x3ff   :  { %948 = vst.msk [vmem:[%s1466_s4 + $0x18] sm:$0xff] %vm763_vm13, %v877_v42 }
 0x401   :  { %v776_v50 = vpop.permute.xlu0 %775  ;;  %v805_v51 = vpop.permute.xlu1 %804 }
 0x402   :  { %779 = vst.msk [vmem:[%s1466_s4] sm:$0xff] %vm778_vm0, %v776_v50 }
 0x403   :  { %807 = vst.msk [vmem:[%s1466_s4 + $0x8] sm:$0xff] %vm763_vm13, %v805_v51 }
 0x405   :  { %v853_v52 = vpop.permute.xlu0 %852  ;;  %v841_v53 = vpop.permute.xlu1 %840 }
 0x406   :  { %940 = vst.msk [vmem:[%s1466_s4 + $0x10] sm:$0xff] %vm763_vm13, %v841_v53 }
 0x407   :  { %941 = vst.msk [vmem:[%s1466_s4 + $0x10] sm:$0xff] %vm768_vm14, %v845_v44 }
 0x408   :  { %942 = vst.msk [vmem:[%s1466_s4 + $0x10] sm:$0xff] %vm773_vm15, %v849_v48 }
 0x409   :  { %v781_v54 = vpop.permute.xlu0 %780  ;;  %943 = vst.msk [vmem:[%s1466_s4 + $0x10] sm:$0xff] %vm778_vm0, %v853_v52  ;;  %v809_v55 = vpop.permute.xlu1 %808 }
 0x40a   :  { %784 = vst.msk [vmem:[%s1466_s4] sm:$0xff] %vm783_vm1, %v781_v54 }
 0x40b   :  { %811 = vst.msk [vmem:[%s1466_s4 + $0x8] sm:$0xff] %vm768_vm14, %v809_v55 }
 0x40d   :  { %v826_v56 = vpop.permute.xlu0 %825  ;;  %v881_v57 = vpop.permute.xlu1 %880 }
 0x40e   :  { %949 = vst.msk [vmem:[%s1466_s4 + $0x18] sm:$0xff] %vm768_vm14, %v881_v57 }
 0x411   :  { %v857_v58 = vpop.permute.xlu0 %856  ;;  %v813_v59 = vpop.permute.xlu1 %812 }
 0x412   :  { %944 = vst.msk [vmem:[%s1466_s4 + $0x10] sm:$0xff] %vm783_vm1, %v857_v58 }
 0x413   :  { %815 = vst.msk [vmem:[%s1466_s4 + $0x8] sm:$0xff] %vm773_vm15, %v813_v59 }
 0x415   :  { %v898_v60 = vpop.permute.xlu0 %897  ;;  %v885_v61 = vpop.permute.xlu1 %884 }
 0x416   :  { %950 = vst.msk [vmem:[%s1466_s4 + $0x18] sm:$0xff] %vm773_vm15, %v885_v61 }
 0x419   :  { %v786_v62 = vpop.permute.xlu0 %785  ;;  %v817_v63 = vpop.permute.xlu1 %816 }
 0x41a   :  { %789 = vst.msk [vmem:[%s1466_s4] sm:$0xff] %vm788_vm2, %v786_v62 }
 0x41b   :  { %819 = vst.msk [vmem:[%s1466_s4 + $0x8] sm:$0xff] %vm778_vm0, %v817_v63 }
 0x41d   :  { %v794_v0 = vpop.permute.xlu0 %793  ;;  %v889_v1 = vpop.permute.xlu1 %888 }
 0x41e   :  { %951 = vst.msk [vmem:[%s1466_s4 + $0x18] sm:$0xff] %vm778_vm0, %v889_v1 }
 0x421   :  { %v866_v3 = vpop.permute.xlu0 %865  ;;  %v821_v2 = vpop.permute.xlu1 %820 }
 0x422   :  { %823 = vst.msk [vmem:[%s1466_s4 + $0x8] sm:$0xff] %vm783_vm1, %v821_v2 }
 0x425   :  { %v828_v4 = vpop.permute.xlu1 %827  ;;  %v834_v6 = vpop.permute.xlu0 %833 }
 0x426   :  { %v830_v5 = vsel %vm829_vm3, %v826_v56, %v828_v4 }
 0x427   :  { %832 = vst.msk [vmem:[%s1466_s4 + $0x8] sm:$0xff] %vm788_vm2, %v830_v5 }
 0x428   :  { %836 = vst.msk [vmem:[%s1466_s4 + $0x8] sm:$0xff] %vm798_vm4, %v834_v6 }
 0x429   :  { %v893_v7 = vpop.permute.xlu1 %892 }
 0x42a   :  { %952 = vst.msk [vmem:[%s1466_s4 + $0x18] sm:$0xff] %vm783_vm1, %v893_v7 }
 0x42d   :  { %v900_v8 = vpop.permute.xlu1 %899 }
 0x42e   :  { %v901_v9 = vsel %vm829_vm3, %v898_v60, %v900_v8 }
 0x42f   :  { %953 = vst.msk [vmem:[%s1466_s4 + $0x18] sm:$0xff] %vm788_vm2, %v901_v9 }
 0x431   :  { %v792_v10 = vpop.permute.xlu1 %791 }
 0x432   :  { %v796_v11 = vsel %vm795_vm5, %v792_v10, %v794_v0 }
 0x433   :  { %799 = vst.msk [vmem:[%s1466_s4] sm:$0xff] %vm798_vm4, %v796_v11 }
 0x435   :  { %v861_v12 = vpop.permute.xlu1 %860 }
 0x436   :  { %945 = vst.msk [vmem:[%s1466_s4 + $0x10] sm:$0xff] %vm788_vm2, %v861_v12 }
 0x439   :  { %v868_v13 = vpop.permute.xlu1 %867 }
 0x43a   :  { %v869_v14 = vsel %vm795_vm5, %v866_v3, %v868_v13 }
 0x43b   :  { %946 = vst.msk [vmem:[%s1466_s4 + $0x10] sm:$0xff] %vm798_vm4, %v869_v14 }
 0x43d   :  { %v905_v15 = vpop.permute.xlu1 %904 }
 0x43e   :  { %954 = vst.msk [vmem:[%s1466_s4 + $0x18] sm:$0xff] %vm798_vm4, %v905_v15 }

</bundles_post_ra>
